<compile_context>
chip_gen: v7x
topology: tpu7x:2x2x1
jax: 0.10.0
libtpu: 0.0.40
codegen_flags: <defaults>
</compile_context>

<pallas_src>
import jax
import jax.numpy as jnp
from jax import lax
from jax.experimental import pallas as pl
from jax.experimental.pallas import tpu as pltpu


def _make_encoder_kernel(num_layers, seq_len, b_pad, hidden):
    """Fused multi-layer LSTM: hoisted input GEMM + wavefront recurrence."""
    H = hidden
    L = num_layers
    G = 4 * H
    n_steps = seq_len + L - 1

    def kernel(x_ref, wih0_ref, b0_ref, wbig_ref, bias_ref, out_ref, gates_scr):
        # ---- hoisted layer-0 input projection (off the serial path) --------
        # (T*Bp, E) @ (E, 4H), f32 accumulation; b0 = b_ih0 + b_hh0 folded in.
        gates_scr[...] = (
            jnp.dot(x_ref[...], wih0_ref[...],
                    preferred_element_type=jnp.float32)
            + b0_ref[...])

        wbig = wbig_ref[...]          # (L*H, L*4H) bf16, resident across loop
        bias = bias_ref[...]          # (1, L*4H)  f32  (block 0 is zero)

        def step(s, carry):
            hs, cs = carry            # tuples of L f32 (Bp, H) arrays
            # single bf16 cast per step; one fused block-bidiagonal matmul
            lhs = jnp.concatenate(hs, axis=1).astype(jnp.bfloat16)  # (Bp, L*H)
            rec = jnp.dot(lhs, wbig, preferred_element_type=jnp.float32)
            g_all = rec + bias                                       # (Bp, L*4H)

            # layer 0 consumes its precomputed input gates at time t0 = s
            t0 = jnp.minimum(s, seq_len - 1)          # clamp (masked anyway)
            start = pl.multiple_of(t0 * b_pad, b_pad)
            g_in0 = gates_scr[pl.ds(start, b_pad), :]  # aligned (8,128) read

            new_hs, new_cs = [], []
            for l in range(L):                         # static unroll
                g = g_all[:, l * G:(l + 1) * G]
                if l == 0:
                    g = g + g_in0
                # full 128-lane EUP passes; bands only for the VPU combine
                sig = jax.nn.sigmoid(g)
                th = jnp.tanh(g)
                i_g = sig[:, 0 * H:1 * H]
                f_g = sig[:, 1 * H:2 * H]
                o_g = sig[:, 3 * H:4 * H]
                g_g = th[:, 2 * H:3 * H]
                c_new = f_g * cs[l] + i_g * g_g
                h_new = o_g * jnp.tanh(c_new)
                # wavefront validity: layer l is active for l <= s <= T-1+l
                m = jnp.logical_and(s >= l, s <= seq_len - 1 + l)
                m = m.astype(jnp.float32)
                new_hs.append(m * h_new + (1.0 - m) * hs[l])
                new_cs.append(m * c_new + (1.0 - m) * cs[l])
            return tuple(new_hs), tuple(new_cs)

        zeros = tuple(jnp.zeros((b_pad, H), jnp.float32) for _ in range(L))
        unroll = n_steps if n_steps <= 32 else 8       # partial unroll
        hs, cs = lax.fori_loop(0, n_steps, step, (zeros, zeros), unroll=unroll)

        # one packed lane-dense (Bp, 2*L*H) store (128 lanes for L=2, H=32)
        out_ref[...] = jnp.concatenate(list(hs) + list(cs), axis=1)

    return kernel


def _encoder_pallas(x, wih0, b0, wbig, bias, num_layers, seq_len, b_pad, hidden):
    kernel = _make_encoder_kernel(num_layers, seq_len, b_pad, hidden)
    vmem = pltpu.MemorySpace.VMEM
    return pl.pallas_call(
        kernel,
        out_shape=jax.ShapeDtypeStruct(
            (b_pad, 2 * num_layers * hidden), jnp.float32),
        in_specs=[pl.BlockSpec(memory_space=vmem)] * 5,
        out_specs=pl.BlockSpec(memory_space=vmem),
        scratch_shapes=[
            # TODO(synk): for long T on v7x (64 MiB VMEM), chunk the hoisted
            # GEMM over time blocks and/or store this buffer in bf16.
            pltpu.VMEM((seq_len * b_pad, 4 * hidden), jnp.float32),
        ],
    )(x, wih0, b0, wbig, bias)


def init_encoder_params(key, input_size, embedding_size, hidden_size, num_layers):
    """Deterministic parameter init matching the PyTorch module's shapes."""
    keys = jax.random.split(key, 1 + 4 * num_layers)
    params = {"embedding": jax.random.normal(
        keys[0], (input_size, embedding_size), jnp.float32) * 0.1}
    layers = []
    k = 1.0 / jnp.sqrt(hidden_size)
    for l in range(num_layers):
        in_dim = embedding_size if l == 0 else hidden_size
        kw = keys[1 + 4 * l: 1 + 4 * (l + 1)]
        layers.append({
            "w_ih": jax.random.uniform(kw[0], (4 * hidden_size, in_dim),
                                       jnp.float32, -k, k),
            "w_hh": jax.random.uniform(kw[1], (4 * hidden_size, hidden_size),
                                       jnp.float32, -k, k),
            "b_ih": jax.random.uniform(kw[2], (4 * hidden_size,),
                                       jnp.float32, -k, k),
            "b_hh": jax.random.uniform(kw[3], (4 * hidden_size,),
                                       jnp.float32, -k, k),
        })
    params["layers"] = layers
    return params


@jax.jit
def encoder_forward(params, tokens):
    """tokens: (B, T) int32 batch-first. Returns (hidden, cell): (L, B, H)."""
    B, T = tokens.shape
    L = len(params["layers"])
    H = params["layers"][0]["w_hh"].shape[1]
    E = params["embedding"].shape[1]
    G = 4 * H

    # Pad batch to a full sublane tile (8) so every in-kernel slab is aligned.
    b_pad = max(8, -(-B // 8) * 8)
    tokens_p = jnp.pad(tokens, ((0, b_pad - B), (0, 0)))   # pad with token 0

    # Embedding gather (glue, stays in XLA) + eval-mode dropout (identity).
    emb = jnp.take(params["embedding"], tokens_p, axis=0)        # (Bp, T, E)
    x = jnp.transpose(emb, (1, 0, 2)).reshape(T * b_pad, E)      # time-major
    x = x.astype(jnp.bfloat16)

    # Layer-0 input-projection operands (hoisted GEMM runs inside the kernel).
    l0 = params["layers"][0]
    wih0 = l0["w_ih"].T.astype(jnp.bfloat16)                     # (E, 4H)
    b0 = (l0["b_ih"] + l0["b_hh"]).reshape(1, G).astype(jnp.float32)

    # Block-bidiagonal fused recurrent weight: rows = carried h of each layer,
    # col-block l = layer l's gates.  (l,l) = w_hh_l^T; (l-1,l) = w_ih_l^T.
    wbig = jnp.zeros((L * H, L * G), jnp.float32)
    bias = jnp.zeros((1, L * G), jnp.float32)
    for l, layer in enumerate(params["layers"]):
        wbig = wbig.at[l * H:(l + 1) * H, l * G:(l + 1) * G].set(layer["w_hh"].T)
        if l > 0:
            wbig = wbig.at[(l - 1) * H:l * H, l * G:(l + 1) * G].set(
                layer["w_ih"].T)
            bias = bias.at[0, l * G:(l + 1) * G].set(
                layer["b_ih"] + layer["b_hh"])
    wbig = wbig.astype(jnp.bfloat16)

    packed = _encoder_pallas(x, wih0, b0, wbig, bias, L, T, b_pad, H)

    hidden = jnp.stack([packed[:B, l * H:(l + 1) * H] for l in range(L)], 0)
    cell = jnp.stack(
        [packed[:B, (L + l) * H:(L + l + 1) * H] for l in range(L)], 0)
    return hidden, cell


def encoder_reference(params, tokens):
    """Pure-JAX f32 reference matching torch.nn.LSTM (batch_first) semantics."""
    emb = jnp.take(params["embedding"], tokens, axis=0).astype(jnp.float32)
    B, T, _ = emb.shape
    inp = emb
    hs, cs = [], []
    for layer in params["layers"]:
        H = layer["w_hh"].shape[1]
        h = jnp.zeros((B, H), jnp.float32)
        c = jnp.zeros((B, H), jnp.float32)
        outs = []
        for t in range(T):
            g = (inp[:, t] @ layer["w_ih"].T + layer["b_ih"]
                 + h @ layer["w_hh"].T + layer["b_hh"])
            i = jax.nn.sigmoid(g[:, 0 * H:1 * H])
            f = jax.nn.sigmoid(g[:, 1 * H:2 * H])
            gg = jnp.tanh(g[:, 2 * H:3 * H])
            o = jax.nn.sigmoid(g[:, 3 * H:4 * H])
            c = f * c + i * gg
            h = o * jnp.tanh(c)
            outs.append(h)
        inp = jnp.stack(outs, axis=1)
        hs.append(h)
        cs.append(c)
    return jnp.stack(hs, 0), jnp.stack(cs, 0)


if __name__ == "__main__":
    # Small shapes consistent with the module's forward.
    input_size = 50        # vocab
    embedding_size = 32
    hidden_size = 32
    num_layers = 2
    batch = 2
    seq = 8

    key = jax.random.PRNGKey(0)
    pkey, xkey = jax.random.split(key)
    params = init_encoder_params(pkey, input_size, embedding_size,
                                 hidden_size, num_layers)
    tokens = jax.random.randint(xkey, (batch, seq), 0, input_size, jnp.int32)

    hidden, cell = encoder_forward(params, tokens)
    jax.block_until_ready((hidden, cell))
    assert hidden.shape == (num_layers, batch, hidden_size)
    assert cell.shape == (num_layers, batch, hidden_size)

    # Sanity check vs f32 reference (bf16 MXU operands -> loose tolerance).
    h_ref, c_ref = encoder_reference(params, tokens)
    max_err = max(float(jnp.max(jnp.abs(hidden - h_ref))),
                  float(jnp.max(jnp.abs(cell - c_ref))))
    assert max_err < 5e-2, f"numerical mismatch vs reference: {max_err}"
    print("KERNEL_OK")
</pallas_src>

<mosaic_0001>
module attributes {stable_mosaic.version = 11 : i64} {
  func.func @kernel(%arg0: memref<64x32xbf16, #tpu.memory_space<vmem>>, %arg1: memref<32x128xbf16, #tpu.memory_space<vmem>>, %arg2: memref<1x128xf32, #tpu.memory_space<vmem>>, %arg3: memref<64x256xbf16, #tpu.memory_space<vmem>>, %arg4: memref<1x256xf32, #tpu.memory_space<vmem>>, %arg5: memref<8x128xf32, #tpu.memory_space<vmem>>, %arg6: memref<64x128xf32, #tpu.memory_space<vmem>>) attributes {dimension_semantics = [], scalar_prefetch = 0 : i64, scratch_operands = 1 : i64, tpu.core_type = #tpu.core_type<tc>} {
    %c0 = arith.constant 0 : index
    %c0_0 = arith.constant 0 : index
    %0 = vector.load %arg0[%c0, %c0_0] : memref<64x32xbf16, #tpu.memory_space<vmem>>, vector<64x32xbf16>
    %c0_1 = arith.constant 0 : index
    %c0_2 = arith.constant 0 : index
    %1 = vector.load %arg1[%c0_1, %c0_2] : memref<32x128xbf16, #tpu.memory_space<vmem>>, vector<32x128xbf16>
    %cst = arith.constant dense<0.000000e+00> : vector<64x128xf32>
    %2 = tpu.matmul %0, %1, %cst {dimension_numbers = #tpu.dot_dimension_numbers<[1], [0], [0], [1], [0, 0, 1, 1], [], []>} : vector<64x32xbf16>, vector<32x128xbf16>, vector<64x128xf32> -> vector<64x128xf32>
    %c0_3 = arith.constant 0 : index
    %c0_4 = arith.constant 0 : index
    %3 = vector.load %arg2[%c0_3, %c0_4] : memref<1x128xf32, #tpu.memory_space<vmem>>, vector<1x128xf32>
    %4 = vector.broadcast %3 : vector<1x128xf32> to vector<64x128xf32>
    %5 = arith.addf %2, %4 : vector<64x128xf32>
    %c0_5 = arith.constant 0 : index
    %c0_6 = arith.constant 0 : index
    %6 = vector.load %arg6[%c0_5, %c0_6] : memref<64x128xf32, #tpu.memory_space<vmem>>, vector<64x128xf32>
    tpu.vector_store %arg6[%c0_5, %c0_6], %5 {strides = array<i32>} : memref<64x128xf32, #tpu.memory_space<vmem>>, vector<64x128xf32>,
    %c0_7 = arith.constant 0 : index
    %c0_8 = arith.constant 0 : index
    %7 = vector.load %arg3[%c0_7, %c0_8] : memref<64x256xbf16, #tpu.memory_space<vmem>>, vector<64x256xbf16>
    %c0_9 = arith.constant 0 : index
    %c0_10 = arith.constant 0 : index
    %8 = vector.load %arg4[%c0_9, %c0_10] : memref<1x256xf32, #tpu.memory_space<vmem>>, vector<1x256xf32>
    %cst_11 = arith.constant 0.000000e+00 : f32
    %9 = vector.broadcast %cst_11 : f32 to vector<8x32xf32>
    %cst_12 = arith.constant 0.000000e+00 : f32
    %10 = vector.broadcast %cst_12 : f32 to vector<8x32xf32>
    %c0_i32 = arith.constant 0 : i32
    %11 = tpu.concatenate %9, %10 in 1 : vector<8x32xf32>, vector<8x32xf32> -> vector<8x64xf32>
    %12 = arith.truncf %11 : vector<8x64xf32> to vector<8x64xbf16>
    %cst_13 = arith.constant dense<0.000000e+00> : vector<8x256xf32>
    %13 = tpu.matmul %12, %7, %cst_13 {dimension_numbers = #tpu.dot_dimension_numbers<[1], [0], [0], [1], [0, 0, 1, 1], [], []>} : vector<8x64xbf16>, vector<64x256xbf16>, vector<8x256xf32> -> vector<8x256xf32>
    %14 = vector.broadcast %8 : vector<1x256xf32> to vector<8x256xf32>
    %15 = arith.addf %13, %14 : vector<8x256xf32>
    %c7_i32 = arith.constant 7 : i32
    %16 = arith.minsi %c0_i32, %c7_i32 : i32
    %c8_i32 = arith.constant 8 : i32
    %17 = arith.muli %16, %c8_i32 : i32
    %18 = tpu.assume_multiple %17, 8 : i32
    %19 = arith.index_cast %18 : i32 to index
    %c0_14 = arith.constant 0 : index
    %20 = vector.load %arg6[%19, %c0_14] : memref<64x128xf32, #tpu.memory_space<vmem>>, vector<8x128xf32>
    %21 = vector.extract_strided_slice %15 {offsets = [0, 0], sizes = [8, 128], strides = [1, 1]} : vector<8x256xf32> to vector<8x128xf32>
    %22 = arith.addf %21, %20 : vector<8x128xf32>
    %23 = arith.negf %22 : vector<8x128xf32>
    %24 = math.exp %23 : vector<8x128xf32>
    %cst_15 = arith.constant 1.000000e+00 : f32
    %25 = vector.broadcast %cst_15 : f32 to vector<8x128xf32>
    %26 = arith.addf %25, %24 : vector<8x128xf32>
    %27 = arith.divf %25, %26 : vector<8x128xf32>
    %28 = math.tanh %22 : vector<8x128xf32>
    %29 = vector.extract_strided_slice %27 {offsets = [0, 0], sizes = [8, 32], strides = [1, 1]} : vector<8x128xf32> to vector<8x32xf32>
    %30 = vector.extract_strided_slice %27 {offsets = [0, 32], sizes = [8, 32], strides = [1, 1]} : vector<8x128xf32> to vector<8x32xf32>
    %31 = vector.extract_strided_slice %27 {offsets = [0, 96], sizes = [8, 32], strides = [1, 1]} : vector<8x128xf32> to vector<8x32xf32>
    %32 = vector.extract_strided_slice %28 {offsets = [0, 64], sizes = [8, 32], strides = [1, 1]} : vector<8x128xf32> to vector<8x32xf32>
    %33 = arith.mulf %30, %9 : vector<8x32xf32>
    %34 = arith.mulf %29, %32 : vector<8x32xf32>
    %35 = arith.addf %33, %34 : vector<8x32xf32>
    %36 = math.tanh %35 : vector<8x32xf32>
    %37 = arith.mulf %31, %36 : vector<8x32xf32>
    %c0_i32_16 = arith.constant 0 : i32
    %38 = arith.cmpi sge, %c0_i32, %c0_i32_16 : i32
    %c7_i32_17 = arith.constant 7 : i32
    %39 = arith.cmpi sle, %c0_i32, %c7_i32_17 : i32
    %40 = arith.andi %38, %39 : i1
    %41 = arith.extui %40 : i1 to i32
    %42 = arith.sitofp %41 : i32 to f32
    %43 = vector.broadcast %42 : f32 to vector<8x32xf32>
    %44 = arith.mulf %43, %37 : vector<8x32xf32>
    %cst_18 = arith.constant 1.000000e+00 : f32
    %45 = arith.subf %cst_18, %42 : f32
    %46 = vector.broadcast %45 : f32 to vector<8x32xf32>
    %47 = arith.mulf %46, %9 : vector<8x32xf32>
    %48 = arith.addf %44, %47 : vector<8x32xf32>
    %49 = vector.broadcast %42 : f32 to vector<8x32xf32>
    %50 = arith.mulf %49, %35 : vector<8x32xf32>
    %cst_19 = arith.constant 1.000000e+00 : f32
    %51 = arith.subf %cst_19, %42 : f32
    %52 = vector.broadcast %51 : f32 to vector<8x32xf32>
    %53 = arith.mulf %52, %9 : vector<8x32xf32>
    %54 = arith.addf %50, %53 : vector<8x32xf32>
    %55 = vector.extract_strided_slice %15 {offsets = [0, 128], sizes = [8, 128], strides = [1, 1]} : vector<8x256xf32> to vector<8x128xf32>
    %56 = arith.negf %55 : vector<8x128xf32>
    %57 = math.exp %56 : vector<8x128xf32>
    %cst_20 = arith.constant 1.000000e+00 : f32
    %58 = vector.broadcast %cst_20 : f32 to vector<8x128xf32>
    %59 = arith.addf %58, %57 : vector<8x128xf32>
    %60 = arith.divf %58, %59 : vector<8x128xf32>
    %61 = math.tanh %55 : vector<8x128xf32>
    %62 = vector.extract_strided_slice %60 {offsets = [0, 0], sizes = [8, 32], strides = [1, 1]} : vector<8x128xf32> to vector<8x32xf32>
    %63 = vector.extract_strided_slice %60 {offsets = [0, 32], sizes = [8, 32], strides = [1, 1]} : vector<8x128xf32> to vector<8x32xf32>
    %64 = vector.extract_strided_slice %60 {offsets = [0, 96], sizes = [8, 32], strides = [1, 1]} : vector<8x128xf32> to vector<8x32xf32>
    %65 = vector.extract_strided_slice %61 {offsets = [0, 64], sizes = [8, 32], strides = [1, 1]} : vector<8x128xf32> to vector<8x32xf32>
    %66 = arith.mulf %63, %10 : vector<8x32xf32>
    %67 = arith.mulf %62, %65 : vector<8x32xf32>
    %68 = arith.addf %66, %67 : vector<8x32xf32>
    %69 = math.tanh %68 : vector<8x32xf32>
    %70 = arith.mulf %64, %69 : vector<8x32xf32>
    %c1_i32 = arith.constant 1 : i32
    %71 = arith.cmpi sge, %c0_i32, %c1_i32 : i32
    %c8_i32_21 = arith.constant 8 : i32
    %72 = arith.cmpi sle, %c0_i32, %c8_i32_21 : i32
    %73 = arith.andi %71, %72 : i1
    %74 = arith.extui %73 : i1 to i32
    %75 = arith.sitofp %74 : i32 to f32
    %76 = vector.broadcast %75 : f32 to vector<8x32xf32>
    %77 = arith.mulf %76, %70 : vector<8x32xf32>
    %cst_22 = arith.constant 1.000000e+00 : f32
    %78 = arith.subf %cst_22, %75 : f32
    %79 = vector.broadcast %78 : f32 to vector<8x32xf32>
    %80 = arith.mulf %79, %10 : vector<8x32xf32>
    %81 = arith.addf %77, %80 : vector<8x32xf32>
    %82 = vector.broadcast %75 : f32 to vector<8x32xf32>
    %83 = arith.mulf %82, %68 : vector<8x32xf32>
    %cst_23 = arith.constant 1.000000e+00 : f32
    %84 = arith.subf %cst_23, %75 : f32
    %85 = vector.broadcast %84 : f32 to vector<8x32xf32>
    %86 = arith.mulf %85, %10 : vector<8x32xf32>
    %87 = arith.addf %83, %86 : vector<8x32xf32>
    %c1_i32_24 = arith.constant 1 : i32
    %88 = tpu.concatenate %48, %81 in 1 : vector<8x32xf32>, vector<8x32xf32> -> vector<8x64xf32>
    %89 = arith.truncf %88 : vector<8x64xf32> to vector<8x64xbf16>
    %cst_25 = arith.constant dense<0.000000e+00> : vector<8x256xf32>
    %90 = tpu.matmul %89, %7, %cst_25 {dimension_numbers = #tpu.dot_dimension_numbers<[1], [0], [0], [1], [0, 0, 1, 1], [], []>} : vector<8x64xbf16>, vector<64x256xbf16>, vector<8x256xf32> -> vector<8x256xf32>
    %91 = vector.broadcast %8 : vector<1x256xf32> to vector<8x256xf32>
    %92 = arith.addf %90, %91 : vector<8x256xf32>
    %c7_i32_26 = arith.constant 7 : i32
    %93 = arith.minsi %c1_i32_24, %c7_i32_26 : i32
    %c8_i32_27 = arith.constant 8 : i32
    %94 = arith.muli %93, %c8_i32_27 : i32
    %95 = tpu.assume_multiple %94, 8 : i32
    %96 = arith.index_cast %95 : i32 to index
    %c0_28 = arith.constant 0 : index
    %97 = vector.load %arg6[%96, %c0_28] : memref<64x128xf32, #tpu.memory_space<vmem>>, vector<8x128xf32>
    %98 = vector.extract_strided_slice %92 {offsets = [0, 0], sizes = [8, 128], strides = [1, 1]} : vector<8x256xf32> to vector<8x128xf32>
    %99 = arith.addf %98, %97 : vector<8x128xf32>
    %100 = arith.negf %99 : vector<8x128xf32>
    %101 = math.exp %100 : vector<8x128xf32>
    %cst_29 = arith.constant 1.000000e+00 : f32
    %102 = vector.broadcast %cst_29 : f32 to vector<8x128xf32>
    %103 = arith.addf %102, %101 : vector<8x128xf32>
    %104 = arith.divf %102, %103 : vector<8x128xf32>
    %105 = math.tanh %99 : vector<8x128xf32>
    %106 = vector.extract_strided_slice %104 {offsets = [0, 0], sizes = [8, 32], strides = [1, 1]} : vector<8x128xf32> to vector<8x32xf32>
    %107 = vector.extract_strided_slice %104 {offsets = [0, 32], sizes = [8, 32], strides = [1, 1]} : vector<8x128xf32> to vector<8x32xf32>
    %108 = vector.extract_strided_slice %104 {offsets = [0, 96], sizes = [8, 32], strides = [1, 1]} : vector<8x128xf32> to vector<8x32xf32>
    %109 = vector.extract_strided_slice %105 {offsets = [0, 64], sizes = [8, 32], strides = [1, 1]} : vector<8x128xf32> to vector<8x32xf32>
    %110 = arith.mulf %107, %54 : vector<8x32xf32>
    %111 = arith.mulf %106, %109 : vector<8x32xf32>
    %112 = arith.addf %110, %111 : vector<8x32xf32>
    %113 = math.tanh %112 : vector<8x32xf32>
    %114 = arith.mulf %108, %113 : vector<8x32xf32>
    %c0_i32_30 = arith.constant 0 : i32
    %115 = arith.cmpi sge, %c1_i32_24, %c0_i32_30 : i32
    %c7_i32_31 = arith.constant 7 : i32
    %116 = arith.cmpi sle, %c1_i32_24, %c7_i32_31 : i32
    %117 = arith.andi %115, %116 : i1
    %118 = arith.extui %117 : i1 to i32
    %119 = arith.sitofp %118 : i32 to f32
    %120 = vector.broadcast %119 : f32 to vector<8x32xf32>
    %121 = arith.mulf %120, %114 : vector<8x32xf32>
    %cst_32 = arith.constant 1.000000e+00 : f32
    %122 = arith.subf %cst_32, %119 : f32
    %123 = vector.broadcast %122 : f32 to vector<8x32xf32>
    %124 = arith.mulf %123, %48 : vector<8x32xf32>
    %125 = arith.addf %121, %124 : vector<8x32xf32>
    %126 = vector.broadcast %119 : f32 to vector<8x32xf32>
    %127 = arith.mulf %126, %112 : vector<8x32xf32>
    %cst_33 = arith.constant 1.000000e+00 : f32
    %128 = arith.subf %cst_33, %119 : f32
    %129 = vector.broadcast %128 : f32 to vector<8x32xf32>
    %130 = arith.mulf %129, %54 : vector<8x32xf32>
    %131 = arith.addf %127, %130 : vector<8x32xf32>
    %132 = vector.extract_strided_slice %92 {offsets = [0, 128], sizes = [8, 128], strides = [1, 1]} : vector<8x256xf32> to vector<8x128xf32>
    %133 = arith.negf %132 : vector<8x128xf32>
    %134 = math.exp %133 : vector<8x128xf32>
    %cst_34 = arith.constant 1.000000e+00 : f32
    %135 = vector.broadcast %cst_34 : f32 to vector<8x128xf32>
    %136 = arith.addf %135, %134 : vector<8x128xf32>
    %137 = arith.divf %135, %136 : vector<8x128xf32>
    %138 = math.tanh %132 : vector<8x128xf32>
    %139 = vector.extract_strided_slice %137 {offsets = [0, 0], sizes = [8, 32], strides = [1, 1]} : vector<8x128xf32> to vector<8x32xf32>
    %140 = vector.extract_strided_slice %137 {offsets = [0, 32], sizes = [8, 32], strides = [1, 1]} : vector<8x128xf32> to vector<8x32xf32>
    %141 = vector.extract_strided_slice %137 {offsets = [0, 96], sizes = [8, 32], strides = [1, 1]} : vector<8x128xf32> to vector<8x32xf32>
    %142 = vector.extract_strided_slice %138 {offsets = [0, 64], sizes = [8, 32], strides = [1, 1]} : vector<8x128xf32> to vector<8x32xf32>
    %143 = arith.mulf %140, %87 : vector<8x32xf32>
    %144 = arith.mulf %139, %142 : vector<8x32xf32>
    %145 = arith.addf %143, %144 : vector<8x32xf32>
    %146 = math.tanh %145 : vector<8x32xf32>
    %147 = arith.mulf %141, %146 : vector<8x32xf32>
    %c1_i32_35 = arith.constant 1 : i32
    %148 = arith.cmpi sge, %c1_i32_24, %c1_i32_35 : i32
    %c8_i32_36 = arith.constant 8 : i32
    %149 = arith.cmpi sle, %c1_i32_24, %c8_i32_36 : i32
    %150 = arith.andi %148, %149 : i1
    %151 = arith.extui %150 : i1 to i32
    %152 = arith.sitofp %151 : i32 to f32
    %153 = vector.broadcast %152 : f32 to vector<8x32xf32>
    %154 = arith.mulf %153, %147 : vector<8x32xf32>
    %cst_37 = arith.constant 1.000000e+00 : f32
    %155 = arith.subf %cst_37, %152 : f32
    %156 = vector.broadcast %155 : f32 to vector<8x32xf32>
    %157 = arith.mulf %156, %81 : vector<8x32xf32>
    %158 = arith.addf %154, %157 : vector<8x32xf32>
    %159 = vector.broadcast %152 : f32 to vector<8x32xf32>
    %160 = arith.mulf %159, %145 : vector<8x32xf32>
    %cst_38 = arith.constant 1.000000e+00 : f32
    %161 = arith.subf %cst_38, %152 : f32
    %162 = vector.broadcast %161 : f32 to vector<8x32xf32>
    %163 = arith.mulf %162, %87 : vector<8x32xf32>
    %164 = arith.addf %160, %163 : vector<8x32xf32>
    %c2_i32 = arith.constant 2 : i32
    %165 = tpu.concatenate %125, %158 in 1 : vector<8x32xf32>, vector<8x32xf32> -> vector<8x64xf32>
    %166 = arith.truncf %165 : vector<8x64xf32> to vector<8x64xbf16>
    %cst_39 = arith.constant dense<0.000000e+00> : vector<8x256xf32>
    %167 = tpu.matmul %166, %7, %cst_39 {dimension_numbers = #tpu.dot_dimension_numbers<[1], [0], [0], [1], [0, 0, 1, 1], [], []>} : vector<8x64xbf16>, vector<64x256xbf16>, vector<8x256xf32> -> vector<8x256xf32>
    %168 = vector.broadcast %8 : vector<1x256xf32> to vector<8x256xf32>
    %169 = arith.addf %167, %168 : vector<8x256xf32>
    %c7_i32_40 = arith.constant 7 : i32
    %170 = arith.minsi %c2_i32, %c7_i32_40 : i32
    %c8_i32_41 = arith.constant 8 : i32
    %171 = arith.muli %170, %c8_i32_41 : i32
    %172 = tpu.assume_multiple %171, 8 : i32
    %173 = arith.index_cast %172 : i32 to index
    %c0_42 = arith.constant 0 : index
    %174 = vector.load %arg6[%173, %c0_42] : memref<64x128xf32, #tpu.memory_space<vmem>>, vector<8x128xf32>
    %175 = vector.extract_strided_slice %169 {offsets = [0, 0], sizes = [8, 128], strides = [1, 1]} : vector<8x256xf32> to vector<8x128xf32>
    %176 = arith.addf %175, %174 : vector<8x128xf32>
    %177 = arith.negf %176 : vector<8x128xf32>
    %178 = math.exp %177 : vector<8x128xf32>
    %cst_43 = arith.constant 1.000000e+00 : f32
    %179 = vector.broadcast %cst_43 : f32 to vector<8x128xf32>
    %180 = arith.addf %179, %178 : vector<8x128xf32>
    %181 = arith.divf %179, %180 : vector<8x128xf32>
    %182 = math.tanh %176 : vector<8x128xf32>
    %183 = vector.extract_strided_slice %181 {offsets = [0, 0], sizes = [8, 32], strides = [1, 1]} : vector<8x128xf32> to vector<8x32xf32>
    %184 = vector.extract_strided_slice %181 {offsets = [0, 32], sizes = [8, 32], strides = [1, 1]} : vector<8x128xf32> to vector<8x32xf32>
    %185 = vector.extract_strided_slice %181 {offsets = [0, 96], sizes = [8, 32], strides = [1, 1]} : vector<8x128xf32> to vector<8x32xf32>
    %186 = vector.extract_strided_slice %182 {offsets = [0, 64], sizes = [8, 32], strides = [1, 1]} : vector<8x128xf32> to vector<8x32xf32>
    %187 = arith.mulf %184, %131 : vector<8x32xf32>
    %188 = arith.mulf %183, %186 : vector<8x32xf32>
    %189 = arith.addf %187, %188 : vector<8x32xf32>
    %190 = math.tanh %189 : vector<8x32xf32>
    %191 = arith.mulf %185, %190 : vector<8x32xf32>
    %c0_i32_44 = arith.constant 0 : i32
    %192 = arith.cmpi sge, %c2_i32, %c0_i32_44 : i32
    %c7_i32_45 = arith.constant 7 : i32
    %193 = arith.cmpi sle, %c2_i32, %c7_i32_45 : i32
    %194 = arith.andi %192, %193 : i1
    %195 = arith.extui %194 : i1 to i32
    %196 = arith.sitofp %195 : i32 to f32
    %197 = vector.broadcast %196 : f32 to vector<8x32xf32>
    %198 = arith.mulf %197, %191 : vector<8x32xf32>
    %cst_46 = arith.constant 1.000000e+00 : f32
    %199 = arith.subf %cst_46, %196 : f32
    %200 = vector.broadcast %199 : f32 to vector<8x32xf32>
    %201 = arith.mulf %200, %125 : vector<8x32xf32>
    %202 = arith.addf %198, %201 : vector<8x32xf32>
    %203 = vector.broadcast %196 : f32 to vector<8x32xf32>
    %204 = arith.mulf %203, %189 : vector<8x32xf32>
    %cst_47 = arith.constant 1.000000e+00 : f32
    %205 = arith.subf %cst_47, %196 : f32
    %206 = vector.broadcast %205 : f32 to vector<8x32xf32>
    %207 = arith.mulf %206, %131 : vector<8x32xf32>
    %208 = arith.addf %204, %207 : vector<8x32xf32>
    %209 = vector.extract_strided_slice %169 {offsets = [0, 128], sizes = [8, 128], strides = [1, 1]} : vector<8x256xf32> to vector<8x128xf32>
    %210 = arith.negf %209 : vector<8x128xf32>
    %211 = math.exp %210 : vector<8x128xf32>
    %cst_48 = arith.constant 1.000000e+00 : f32
    %212 = vector.broadcast %cst_48 : f32 to vector<8x128xf32>
    %213 = arith.addf %212, %211 : vector<8x128xf32>
    %214 = arith.divf %212, %213 : vector<8x128xf32>
    %215 = math.tanh %209 : vector<8x128xf32>
    %216 = vector.extract_strided_slice %214 {offsets = [0, 0], sizes = [8, 32], strides = [1, 1]} : vector<8x128xf32> to vector<8x32xf32>
    %217 = vector.extract_strided_slice %214 {offsets = [0, 32], sizes = [8, 32], strides = [1, 1]} : vector<8x128xf32> to vector<8x32xf32>
    %218 = vector.extract_strided_slice %214 {offsets = [0, 96], sizes = [8, 32], strides = [1, 1]} : vector<8x128xf32> to vector<8x32xf32>
    %219 = vector.extract_strided_slice %215 {offsets = [0, 64], sizes = [8, 32], strides = [1, 1]} : vector<8x128xf32> to vector<8x32xf32>
    %220 = arith.mulf %217, %164 : vector<8x32xf32>
    %221 = arith.mulf %216, %219 : vector<8x32xf32>
    %222 = arith.addf %220, %221 : vector<8x32xf32>
    %223 = math.tanh %222 : vector<8x32xf32>
    %224 = arith.mulf %218, %223 : vector<8x32xf32>
    %c1_i32_49 = arith.constant 1 : i32
    %225 = arith.cmpi sge, %c2_i32, %c1_i32_49 : i32
    %c8_i32_50 = arith.constant 8 : i32
    %226 = arith.cmpi sle, %c2_i32, %c8_i32_50 : i32
    %227 = arith.andi %225, %226 : i1
    %228 = arith.extui %227 : i1 to i32
    %229 = arith.sitofp %228 : i32 to f32
    %230 = vector.broadcast %229 : f32 to vector<8x32xf32>
    %231 = arith.mulf %230, %224 : vector<8x32xf32>
    %cst_51 = arith.constant 1.000000e+00 : f32
    %232 = arith.subf %cst_51, %229 : f32
    %233 = vector.broadcast %232 : f32 to vector<8x32xf32>
    %234 = arith.mulf %233, %158 : vector<8x32xf32>
    %235 = arith.addf %231, %234 : vector<8x32xf32>
    %236 = vector.broadcast %229 : f32 to vector<8x32xf32>
    %237 = arith.mulf %236, %222 : vector<8x32xf32>
    %cst_52 = arith.constant 1.000000e+00 : f32
    %238 = arith.subf %cst_52, %229 : f32
    %239 = vector.broadcast %238 : f32 to vector<8x32xf32>
    %240 = arith.mulf %239, %164 : vector<8x32xf32>
    %241 = arith.addf %237, %240 : vector<8x32xf32>
    %c3_i32 = arith.constant 3 : i32
    %242 = tpu.concatenate %202, %235 in 1 : vector<8x32xf32>, vector<8x32xf32> -> vector<8x64xf32>
    %243 = arith.truncf %242 : vector<8x64xf32> to vector<8x64xbf16>
    %cst_53 = arith.constant dense<0.000000e+00> : vector<8x256xf32>
    %244 = tpu.matmul %243, %7, %cst_53 {dimension_numbers = #tpu.dot_dimension_numbers<[1], [0], [0], [1], [0, 0, 1, 1], [], []>} : vector<8x64xbf16>, vector<64x256xbf16>, vector<8x256xf32> -> vector<8x256xf32>
    %245 = vector.broadcast %8 : vector<1x256xf32> to vector<8x256xf32>
    %246 = arith.addf %244, %245 : vector<8x256xf32>
    %c7_i32_54 = arith.constant 7 : i32
    %247 = arith.minsi %c3_i32, %c7_i32_54 : i32
    %c8_i32_55 = arith.constant 8 : i32
    %248 = arith.muli %247, %c8_i32_55 : i32
    %249 = tpu.assume_multiple %248, 8 : i32
    %250 = arith.index_cast %249 : i32 to index
    %c0_56 = arith.constant 0 : index
    %251 = vector.load %arg6[%250, %c0_56] : memref<64x128xf32, #tpu.memory_space<vmem>>, vector<8x128xf32>
    %252 = vector.extract_strided_slice %246 {offsets = [0, 0], sizes = [8, 128], strides = [1, 1]} : vector<8x256xf32> to vector<8x128xf32>
    %253 = arith.addf %252, %251 : vector<8x128xf32>
    %254 = arith.negf %253 : vector<8x128xf32>
    %255 = math.exp %254 : vector<8x128xf32>
    %cst_57 = arith.constant 1.000000e+00 : f32
    %256 = vector.broadcast %cst_57 : f32 to vector<8x128xf32>
    %257 = arith.addf %256, %255 : vector<8x128xf32>
    %258 = arith.divf %256, %257 : vector<8x128xf32>
    %259 = math.tanh %253 : vector<8x128xf32>
    %260 = vector.extract_strided_slice %258 {offsets = [0, 0], sizes = [8, 32], strides = [1, 1]} : vector<8x128xf32> to vector<8x32xf32>
    %261 = vector.extract_strided_slice %258 {offsets = [0, 32], sizes = [8, 32], strides = [1, 1]} : vector<8x128xf32> to vector<8x32xf32>
    %262 = vector.extract_strided_slice %258 {offsets = [0, 96], sizes = [8, 32], strides = [1, 1]} : vector<8x128xf32> to vector<8x32xf32>
    %263 = vector.extract_strided_slice %259 {offsets = [0, 64], sizes = [8, 32], strides = [1, 1]} : vector<8x128xf32> to vector<8x32xf32>
    %264 = arith.mulf %261, %208 : vector<8x32xf32>
    %265 = arith.mulf %260, %263 : vector<8x32xf32>
    %266 = arith.addf %264, %265 : vector<8x32xf32>
    %267 = math.tanh %266 : vector<8x32xf32>
    %268 = arith.mulf %262, %267 : vector<8x32xf32>
    %c0_i32_58 = arith.constant 0 : i32
    %269 = arith.cmpi sge, %c3_i32, %c0_i32_58 : i32
    %c7_i32_59 = arith.constant 7 : i32
    %270 = arith.cmpi sle, %c3_i32, %c7_i32_59 : i32
    %271 = arith.andi %269, %270 : i1
    %272 = arith.extui %271 : i1 to i32
    %273 = arith.sitofp %272 : i32 to f32
    %274 = vector.broadcast %273 : f32 to vector<8x32xf32>
    %275 = arith.mulf %274, %268 : vector<8x32xf32>
    %cst_60 = arith.constant 1.000000e+00 : f32
    %276 = arith.subf %cst_60, %273 : f32
    %277 = vector.broadcast %276 : f32 to vector<8x32xf32>
    %278 = arith.mulf %277, %202 : vector<8x32xf32>
    %279 = arith.addf %275, %278 : vector<8x32xf32>
    %280 = vector.broadcast %273 : f32 to vector<8x32xf32>
    %281 = arith.mulf %280, %266 : vector<8x32xf32>
    %cst_61 = arith.constant 1.000000e+00 : f32
    %282 = arith.subf %cst_61, %273 : f32
    %283 = vector.broadcast %282 : f32 to vector<8x32xf32>
    %284 = arith.mulf %283, %208 : vector<8x32xf32>
    %285 = arith.addf %281, %284 : vector<8x32xf32>
    %286 = vector.extract_strided_slice %246 {offsets = [0, 128], sizes = [8, 128], strides = [1, 1]} : vector<8x256xf32> to vector<8x128xf32>
    %287 = arith.negf %286 : vector<8x128xf32>
    %288 = math.exp %287 : vector<8x128xf32>
    %cst_62 = arith.constant 1.000000e+00 : f32
    %289 = vector.broadcast %cst_62 : f32 to vector<8x128xf32>
    %290 = arith.addf %289, %288 : vector<8x128xf32>
    %291 = arith.divf %289, %290 : vector<8x128xf32>
    %292 = math.tanh %286 : vector<8x128xf32>
    %293 = vector.extract_strided_slice %291 {offsets = [0, 0], sizes = [8, 32], strides = [1, 1]} : vector<8x128xf32> to vector<8x32xf32>
    %294 = vector.extract_strided_slice %291 {offsets = [0, 32], sizes = [8, 32], strides = [1, 1]} : vector<8x128xf32> to vector<8x32xf32>
    %295 = vector.extract_strided_slice %291 {offsets = [0, 96], sizes = [8, 32], strides = [1, 1]} : vector<8x128xf32> to vector<8x32xf32>
    %296 = vector.extract_strided_slice %292 {offsets = [0, 64], sizes = [8, 32], strides = [1, 1]} : vector<8x128xf32> to vector<8x32xf32>
    %297 = arith.mulf %294, %241 : vector<8x32xf32>
    %298 = arith.mulf %293, %296 : vector<8x32xf32>
    %299 = arith.addf %297, %298 : vector<8x32xf32>
    %300 = math.tanh %299 : vector<8x32xf32>
    %301 = arith.mulf %295, %300 : vector<8x32xf32>
    %c1_i32_63 = arith.constant 1 : i32
    %302 = arith.cmpi sge, %c3_i32, %c1_i32_63 : i32
    %c8_i32_64 = arith.constant 8 : i32
    %303 = arith.cmpi sle, %c3_i32, %c8_i32_64 : i32
    %304 = arith.andi %302, %303 : i1
    %305 = arith.extui %304 : i1 to i32
    %306 = arith.sitofp %305 : i32 to f32
    %307 = vector.broadcast %306 : f32 to vector<8x32xf32>
    %308 = arith.mulf %307, %301 : vector<8x32xf32>
    %cst_65 = arith.constant 1.000000e+00 : f32
    %309 = arith.subf %cst_65, %306 : f32
    %310 = vector.broadcast %309 : f32 to vector<8x32xf32>
    %311 = arith.mulf %310, %235 : vector<8x32xf32>
    %312 = arith.addf %308, %311 : vector<8x32xf32>
    %313 = vector.broadcast %306 : f32 to vector<8x32xf32>
    %314 = arith.mulf %313, %299 : vector<8x32xf32>
    %cst_66 = arith.constant 1.000000e+00 : f32
    %315 = arith.subf %cst_66, %306 : f32
    %316 = vector.broadcast %315 : f32 to vector<8x32xf32>
    %317 = arith.mulf %316, %241 : vector<8x32xf32>
    %318 = arith.addf %314, %317 : vector<8x32xf32>
    %c4_i32 = arith.constant 4 : i32
    %319 = tpu.concatenate %279, %312 in 1 : vector<8x32xf32>, vector<8x32xf32> -> vector<8x64xf32>
    %320 = arith.truncf %319 : vector<8x64xf32> to vector<8x64xbf16>
    %cst_67 = arith.constant dense<0.000000e+00> : vector<8x256xf32>
    %321 = tpu.matmul %320, %7, %cst_67 {dimension_numbers = #tpu.dot_dimension_numbers<[1], [0], [0], [1], [0, 0, 1, 1], [], []>} : vector<8x64xbf16>, vector<64x256xbf16>, vector<8x256xf32> -> vector<8x256xf32>
    %322 = vector.broadcast %8 : vector<1x256xf32> to vector<8x256xf32>
    %323 = arith.addf %321, %322 : vector<8x256xf32>
    %c7_i32_68 = arith.constant 7 : i32
    %324 = arith.minsi %c4_i32, %c7_i32_68 : i32
    %c8_i32_69 = arith.constant 8 : i32
    %325 = arith.muli %324, %c8_i32_69 : i32
    %326 = tpu.assume_multiple %325, 8 : i32
    %327 = arith.index_cast %326 : i32 to index
    %c0_70 = arith.constant 0 : index
    %328 = vector.load %arg6[%327, %c0_70] : memref<64x128xf32, #tpu.memory_space<vmem>>, vector<8x128xf32>
    %329 = vector.extract_strided_slice %323 {offsets = [0, 0], sizes = [8, 128], strides = [1, 1]} : vector<8x256xf32> to vector<8x128xf32>
    %330 = arith.addf %329, %328 : vector<8x128xf32>
    %331 = arith.negf %330 : vector<8x128xf32>
    %332 = math.exp %331 : vector<8x128xf32>
    %cst_71 = arith.constant 1.000000e+00 : f32
    %333 = vector.broadcast %cst_71 : f32 to vector<8x128xf32>
    %334 = arith.addf %333, %332 : vector<8x128xf32>
    %335 = arith.divf %333, %334 : vector<8x128xf32>
    %336 = math.tanh %330 : vector<8x128xf32>
    %337 = vector.extract_strided_slice %335 {offsets = [0, 0], sizes = [8, 32], strides = [1, 1]} : vector<8x128xf32> to vector<8x32xf32>
    %338 = vector.extract_strided_slice %335 {offsets = [0, 32], sizes = [8, 32], strides = [1, 1]} : vector<8x128xf32> to vector<8x32xf32>
    %339 = vector.extract_strided_slice %335 {offsets = [0, 96], sizes = [8, 32], strides = [1, 1]} : vector<8x128xf32> to vector<8x32xf32>
    %340 = vector.extract_strided_slice %336 {offsets = [0, 64], sizes = [8, 32], strides = [1, 1]} : vector<8x128xf32> to vector<8x32xf32>
    %341 = arith.mulf %338, %285 : vector<8x32xf32>
    %342 = arith.mulf %337, %340 : vector<8x32xf32>
    %343 = arith.addf %341, %342 : vector<8x32xf32>
    %344 = math.tanh %343 : vector<8x32xf32>
    %345 = arith.mulf %339, %344 : vector<8x32xf32>
    %c0_i32_72 = arith.constant 0 : i32
    %346 = arith.cmpi sge, %c4_i32, %c0_i32_72 : i32
    %c7_i32_73 = arith.constant 7 : i32
    %347 = arith.cmpi sle, %c4_i32, %c7_i32_73 : i32
    %348 = arith.andi %346, %347 : i1
    %349 = arith.extui %348 : i1 to i32
    %350 = arith.sitofp %349 : i32 to f32
    %351 = vector.broadcast %350 : f32 to vector<8x32xf32>
    %352 = arith.mulf %351, %345 : vector<8x32xf32>
    %cst_74 = arith.constant 1.000000e+00 : f32
    %353 = arith.subf %cst_74, %350 : f32
    %354 = vector.broadcast %353 : f32 to vector<8x32xf32>
    %355 = arith.mulf %354, %279 : vector<8x32xf32>
    %356 = arith.addf %352, %355 : vector<8x32xf32>
    %357 = vector.broadcast %350 : f32 to vector<8x32xf32>
    %358 = arith.mulf %357, %343 : vector<8x32xf32>
    %cst_75 = arith.constant 1.000000e+00 : f32
    %359 = arith.subf %cst_75, %350 : f32
    %360 = vector.broadcast %359 : f32 to vector<8x32xf32>
    %361 = arith.mulf %360, %285 : vector<8x32xf32>
    %362 = arith.addf %358, %361 : vector<8x32xf32>
    %363 = vector.extract_strided_slice %323 {offsets = [0, 128], sizes = [8, 128], strides = [1, 1]} : vector<8x256xf32> to vector<8x128xf32>
    %364 = arith.negf %363 : vector<8x128xf32>
    %365 = math.exp %364 : vector<8x128xf32>
    %cst_76 = arith.constant 1.000000e+00 : f32
    %366 = vector.broadcast %cst_76 : f32 to vector<8x128xf32>
    %367 = arith.addf %366, %365 : vector<8x128xf32>
    %368 = arith.divf %366, %367 : vector<8x128xf32>
    %369 = math.tanh %363 : vector<8x128xf32>
    %370 = vector.extract_strided_slice %368 {offsets = [0, 0], sizes = [8, 32], strides = [1, 1]} : vector<8x128xf32> to vector<8x32xf32>
    %371 = vector.extract_strided_slice %368 {offsets = [0, 32], sizes = [8, 32], strides = [1, 1]} : vector<8x128xf32> to vector<8x32xf32>
    %372 = vector.extract_strided_slice %368 {offsets = [0, 96], sizes = [8, 32], strides = [1, 1]} : vector<8x128xf32> to vector<8x32xf32>
    %373 = vector.extract_strided_slice %369 {offsets = [0, 64], sizes = [8, 32], strides = [1, 1]} : vector<8x128xf32> to vector<8x32xf32>
    %374 = arith.mulf %371, %318 : vector<8x32xf32>
    %375 = arith.mulf %370, %373 : vector<8x32xf32>
    %376 = arith.addf %374, %375 : vector<8x32xf32>
    %377 = math.tanh %376 : vector<8x32xf32>
    %378 = arith.mulf %372, %377 : vector<8x32xf32>
    %c1_i32_77 = arith.constant 1 : i32
    %379 = arith.cmpi sge, %c4_i32, %c1_i32_77 : i32
    %c8_i32_78 = arith.constant 8 : i32
    %380 = arith.cmpi sle, %c4_i32, %c8_i32_78 : i32
    %381 = arith.andi %379, %380 : i1
    %382 = arith.extui %381 : i1 to i32
    %383 = arith.sitofp %382 : i32 to f32
    %384 = vector.broadcast %383 : f32 to vector<8x32xf32>
    %385 = arith.mulf %384, %378 : vector<8x32xf32>
    %cst_79 = arith.constant 1.000000e+00 : f32
    %386 = arith.subf %cst_79, %383 : f32
    %387 = vector.broadcast %386 : f32 to vector<8x32xf32>
    %388 = arith.mulf %387, %312 : vector<8x32xf32>
    %389 = arith.addf %385, %388 : vector<8x32xf32>
    %390 = vector.broadcast %383 : f32 to vector<8x32xf32>
    %391 = arith.mulf %390, %376 : vector<8x32xf32>
    %cst_80 = arith.constant 1.000000e+00 : f32
    %392 = arith.subf %cst_80, %383 : f32
    %393 = vector.broadcast %392 : f32 to vector<8x32xf32>
    %394 = arith.mulf %393, %318 : vector<8x32xf32>
    %395 = arith.addf %391, %394 : vector<8x32xf32>
    %c5_i32 = arith.constant 5 : i32
    %396 = tpu.concatenate %356, %389 in 1 : vector<8x32xf32>, vector<8x32xf32> -> vector<8x64xf32>
    %397 = arith.truncf %396 : vector<8x64xf32> to vector<8x64xbf16>
    %cst_81 = arith.constant dense<0.000000e+00> : vector<8x256xf32>
    %398 = tpu.matmul %397, %7, %cst_81 {dimension_numbers = #tpu.dot_dimension_numbers<[1], [0], [0], [1], [0, 0, 1, 1], [], []>} : vector<8x64xbf16>, vector<64x256xbf16>, vector<8x256xf32> -> vector<8x256xf32>
    %399 = vector.broadcast %8 : vector<1x256xf32> to vector<8x256xf32>
    %400 = arith.addf %398, %399 : vector<8x256xf32>
    %c7_i32_82 = arith.constant 7 : i32
    %401 = arith.minsi %c5_i32, %c7_i32_82 : i32
    %c8_i32_83 = arith.constant 8 : i32
    %402 = arith.muli %401, %c8_i32_83 : i32
    %403 = tpu.assume_multiple %402, 8 : i32
    %404 = arith.index_cast %403 : i32 to index
    %c0_84 = arith.constant 0 : index
    %405 = vector.load %arg6[%404, %c0_84] : memref<64x128xf32, #tpu.memory_space<vmem>>, vector<8x128xf32>
    %406 = vector.extract_strided_slice %400 {offsets = [0, 0], sizes = [8, 128], strides = [1, 1]} : vector<8x256xf32> to vector<8x128xf32>
    %407 = arith.addf %406, %405 : vector<8x128xf32>
    %408 = arith.negf %407 : vector<8x128xf32>
    %409 = math.exp %408 : vector<8x128xf32>
    %cst_85 = arith.constant 1.000000e+00 : f32
    %410 = vector.broadcast %cst_85 : f32 to vector<8x128xf32>
    %411 = arith.addf %410, %409 : vector<8x128xf32>
    %412 = arith.divf %410, %411 : vector<8x128xf32>
    %413 = math.tanh %407 : vector<8x128xf32>
    %414 = vector.extract_strided_slice %412 {offsets = [0, 0], sizes = [8, 32], strides = [1, 1]} : vector<8x128xf32> to vector<8x32xf32>
    %415 = vector.extract_strided_slice %412 {offsets = [0, 32], sizes = [8, 32], strides = [1, 1]} : vector<8x128xf32> to vector<8x32xf32>
    %416 = vector.extract_strided_slice %412 {offsets = [0, 96], sizes = [8, 32], strides = [1, 1]} : vector<8x128xf32> to vector<8x32xf32>
    %417 = vector.extract_strided_slice %413 {offsets = [0, 64], sizes = [8, 32], strides = [1, 1]} : vector<8x128xf32> to vector<8x32xf32>
    %418 = arith.mulf %415, %362 : vector<8x32xf32>
    %419 = arith.mulf %414, %417 : vector<8x32xf32>
    %420 = arith.addf %418, %419 : vector<8x32xf32>
    %421 = math.tanh %420 : vector<8x32xf32>
    %422 = arith.mulf %416, %421 : vector<8x32xf32>
    %c0_i32_86 = arith.constant 0 : i32
    %423 = arith.cmpi sge, %c5_i32, %c0_i32_86 : i32
    %c7_i32_87 = arith.constant 7 : i32
    %424 = arith.cmpi sle, %c5_i32, %c7_i32_87 : i32
    %425 = arith.andi %423, %424 : i1
    %426 = arith.extui %425 : i1 to i32
    %427 = arith.sitofp %426 : i32 to f32
    %428 = vector.broadcast %427 : f32 to vector<8x32xf32>
    %429 = arith.mulf %428, %422 : vector<8x32xf32>
    %cst_88 = arith.constant 1.000000e+00 : f32
    %430 = arith.subf %cst_88, %427 : f32
    %431 = vector.broadcast %430 : f32 to vector<8x32xf32>
    %432 = arith.mulf %431, %356 : vector<8x32xf32>
    %433 = arith.addf %429, %432 : vector<8x32xf32>
    %434 = vector.broadcast %427 : f32 to vector<8x32xf32>
    %435 = arith.mulf %434, %420 : vector<8x32xf32>
    %cst_89 = arith.constant 1.000000e+00 : f32
    %436 = arith.subf %cst_89, %427 : f32
    %437 = vector.broadcast %436 : f32 to vector<8x32xf32>
    %438 = arith.mulf %437, %362 : vector<8x32xf32>
    %439 = arith.addf %435, %438 : vector<8x32xf32>
    %440 = vector.extract_strided_slice %400 {offsets = [0, 128], sizes = [8, 128], strides = [1, 1]} : vector<8x256xf32> to vector<8x128xf32>
    %441 = arith.negf %440 : vector<8x128xf32>
    %442 = math.exp %441 : vector<8x128xf32>
    %cst_90 = arith.constant 1.000000e+00 : f32
    %443 = vector.broadcast %cst_90 : f32 to vector<8x128xf32>
    %444 = arith.addf %443, %442 : vector<8x128xf32>
    %445 = arith.divf %443, %444 : vector<8x128xf32>
    %446 = math.tanh %440 : vector<8x128xf32>
    %447 = vector.extract_strided_slice %445 {offsets = [0, 0], sizes = [8, 32], strides = [1, 1]} : vector<8x128xf32> to vector<8x32xf32>
    %448 = vector.extract_strided_slice %445 {offsets = [0, 32], sizes = [8, 32], strides = [1, 1]} : vector<8x128xf32> to vector<8x32xf32>
    %449 = vector.extract_strided_slice %445 {offsets = [0, 96], sizes = [8, 32], strides = [1, 1]} : vector<8x128xf32> to vector<8x32xf32>
    %450 = vector.extract_strided_slice %446 {offsets = [0, 64], sizes = [8, 32], strides = [1, 1]} : vector<8x128xf32> to vector<8x32xf32>
    %451 = arith.mulf %448, %395 : vector<8x32xf32>
    %452 = arith.mulf %447, %450 : vector<8x32xf32>
    %453 = arith.addf %451, %452 : vector<8x32xf32>
    %454 = math.tanh %453 : vector<8x32xf32>
    %455 = arith.mulf %449, %454 : vector<8x32xf32>
    %c1_i32_91 = arith.constant 1 : i32
    %456 = arith.cmpi sge, %c5_i32, %c1_i32_91 : i32
    %c8_i32_92 = arith.constant 8 : i32
    %457 = arith.cmpi sle, %c5_i32, %c8_i32_92 : i32
    %458 = arith.andi %456, %457 : i1
    %459 = arith.extui %458 : i1 to i32
    %460 = arith.sitofp %459 : i32 to f32
    %461 = vector.broadcast %460 : f32 to vector<8x32xf32>
    %462 = arith.mulf %461, %455 : vector<8x32xf32>
    %cst_93 = arith.constant 1.000000e+00 : f32
    %463 = arith.subf %cst_93, %460 : f32
    %464 = vector.broadcast %463 : f32 to vector<8x32xf32>
    %465 = arith.mulf %464, %389 : vector<8x32xf32>
    %466 = arith.addf %462, %465 : vector<8x32xf32>
    %467 = vector.broadcast %460 : f32 to vector<8x32xf32>
    %468 = arith.mulf %467, %453 : vector<8x32xf32>
    %cst_94 = arith.constant 1.000000e+00 : f32
    %469 = arith.subf %cst_94, %460 : f32
    %470 = vector.broadcast %469 : f32 to vector<8x32xf32>
    %471 = arith.mulf %470, %395 : vector<8x32xf32>
    %472 = arith.addf %468, %471 : vector<8x32xf32>
    %c6_i32 = arith.constant 6 : i32
    %473 = tpu.concatenate %433, %466 in 1 : vector<8x32xf32>, vector<8x32xf32> -> vector<8x64xf32>
    %474 = arith.truncf %473 : vector<8x64xf32> to vector<8x64xbf16>
    %cst_95 = arith.constant dense<0.000000e+00> : vector<8x256xf32>
    %475 = tpu.matmul %474, %7, %cst_95 {dimension_numbers = #tpu.dot_dimension_numbers<[1], [0], [0], [1], [0, 0, 1, 1], [], []>} : vector<8x64xbf16>, vector<64x256xbf16>, vector<8x256xf32> -> vector<8x256xf32>
    %476 = vector.broadcast %8 : vector<1x256xf32> to vector<8x256xf32>
    %477 = arith.addf %475, %476 : vector<8x256xf32>
    %c7_i32_96 = arith.constant 7 : i32
    %478 = arith.minsi %c6_i32, %c7_i32_96 : i32
    %c8_i32_97 = arith.constant 8 : i32
    %479 = arith.muli %478, %c8_i32_97 : i32
    %480 = tpu.assume_multiple %479, 8 : i32
    %481 = arith.index_cast %480 : i32 to index
    %c0_98 = arith.constant 0 : index
    %482 = vector.load %arg6[%481, %c0_98] : memref<64x128xf32, #tpu.memory_space<vmem>>, vector<8x128xf32>
    %483 = vector.extract_strided_slice %477 {offsets = [0, 0], sizes = [8, 128], strides = [1, 1]} : vector<8x256xf32> to vector<8x128xf32>
    %484 = arith.addf %483, %482 : vector<8x128xf32>
    %485 = arith.negf %484 : vector<8x128xf32>
    %486 = math.exp %485 : vector<8x128xf32>
    %cst_99 = arith.constant 1.000000e+00 : f32
    %487 = vector.broadcast %cst_99 : f32 to vector<8x128xf32>
    %488 = arith.addf %487, %486 : vector<8x128xf32>
    %489 = arith.divf %487, %488 : vector<8x128xf32>
    %490 = math.tanh %484 : vector<8x128xf32>
    %491 = vector.extract_strided_slice %489 {offsets = [0, 0], sizes = [8, 32], strides = [1, 1]} : vector<8x128xf32> to vector<8x32xf32>
    %492 = vector.extract_strided_slice %489 {offsets = [0, 32], sizes = [8, 32], strides = [1, 1]} : vector<8x128xf32> to vector<8x32xf32>
    %493 = vector.extract_strided_slice %489 {offsets = [0, 96], sizes = [8, 32], strides = [1, 1]} : vector<8x128xf32> to vector<8x32xf32>
    %494 = vector.extract_strided_slice %490 {offsets = [0, 64], sizes = [8, 32], strides = [1, 1]} : vector<8x128xf32> to vector<8x32xf32>
    %495 = arith.mulf %492, %439 : vector<8x32xf32>
    %496 = arith.mulf %491, %494 : vector<8x32xf32>
    %497 = arith.addf %495, %496 : vector<8x32xf32>
    %498 = math.tanh %497 : vector<8x32xf32>
    %499 = arith.mulf %493, %498 : vector<8x32xf32>
    %c0_i32_100 = arith.constant 0 : i32
    %500 = arith.cmpi sge, %c6_i32, %c0_i32_100 : i32
    %c7_i32_101 = arith.constant 7 : i32
    %501 = arith.cmpi sle, %c6_i32, %c7_i32_101 : i32
    %502 = arith.andi %500, %501 : i1
    %503 = arith.extui %502 : i1 to i32
    %504 = arith.sitofp %503 : i32 to f32
    %505 = vector.broadcast %504 : f32 to vector<8x32xf32>
    %506 = arith.mulf %505, %499 : vector<8x32xf32>
    %cst_102 = arith.constant 1.000000e+00 : f32
    %507 = arith.subf %cst_102, %504 : f32
    %508 = vector.broadcast %507 : f32 to vector<8x32xf32>
    %509 = arith.mulf %508, %433 : vector<8x32xf32>
    %510 = arith.addf %506, %509 : vector<8x32xf32>
    %511 = vector.broadcast %504 : f32 to vector<8x32xf32>
    %512 = arith.mulf %511, %497 : vector<8x32xf32>
    %cst_103 = arith.constant 1.000000e+00 : f32
    %513 = arith.subf %cst_103, %504 : f32
    %514 = vector.broadcast %513 : f32 to vector<8x32xf32>
    %515 = arith.mulf %514, %439 : vector<8x32xf32>
    %516 = arith.addf %512, %515 : vector<8x32xf32>
    %517 = vector.extract_strided_slice %477 {offsets = [0, 128], sizes = [8, 128], strides = [1, 1]} : vector<8x256xf32> to vector<8x128xf32>
    %518 = arith.negf %517 : vector<8x128xf32>
    %519 = math.exp %518 : vector<8x128xf32>
    %cst_104 = arith.constant 1.000000e+00 : f32
    %520 = vector.broadcast %cst_104 : f32 to vector<8x128xf32>
    %521 = arith.addf %520, %519 : vector<8x128xf32>
    %522 = arith.divf %520, %521 : vector<8x128xf32>
    %523 = math.tanh %517 : vector<8x128xf32>
    %524 = vector.extract_strided_slice %522 {offsets = [0, 0], sizes = [8, 32], strides = [1, 1]} : vector<8x128xf32> to vector<8x32xf32>
    %525 = vector.extract_strided_slice %522 {offsets = [0, 32], sizes = [8, 32], strides = [1, 1]} : vector<8x128xf32> to vector<8x32xf32>
    %526 = vector.extract_strided_slice %522 {offsets = [0, 96], sizes = [8, 32], strides = [1, 1]} : vector<8x128xf32> to vector<8x32xf32>
    %527 = vector.extract_strided_slice %523 {offsets = [0, 64], sizes = [8, 32], strides = [1, 1]} : vector<8x128xf32> to vector<8x32xf32>
    %528 = arith.mulf %525, %472 : vector<8x32xf32>
    %529 = arith.mulf %524, %527 : vector<8x32xf32>
    %530 = arith.addf %528, %529 : vector<8x32xf32>
    %531 = math.tanh %530 : vector<8x32xf32>
    %532 = arith.mulf %526, %531 : vector<8x32xf32>
    %c1_i32_105 = arith.constant 1 : i32
    %533 = arith.cmpi sge, %c6_i32, %c1_i32_105 : i32
    %c8_i32_106 = arith.constant 8 : i32
    %534 = arith.cmpi sle, %c6_i32, %c8_i32_106 : i32
    %535 = arith.andi %533, %534 : i1
    %536 = arith.extui %535 : i1 to i32
    %537 = arith.sitofp %536 : i32 to f32
    %538 = vector.broadcast %537 : f32 to vector<8x32xf32>
    %539 = arith.mulf %538, %532 : vector<8x32xf32>
    %cst_107 = arith.constant 1.000000e+00 : f32
    %540 = arith.subf %cst_107, %537 : f32
    %541 = vector.broadcast %540 : f32 to vector<8x32xf32>
    %542 = arith.mulf %541, %466 : vector<8x32xf32>
    %543 = arith.addf %539, %542 : vector<8x32xf32>
    %544 = vector.broadcast %537 : f32 to vector<8x32xf32>
    %545 = arith.mulf %544, %530 : vector<8x32xf32>
    %cst_108 = arith.constant 1.000000e+00 : f32
    %546 = arith.subf %cst_108, %537 : f32
    %547 = vector.broadcast %546 : f32 to vector<8x32xf32>
    %548 = arith.mulf %547, %472 : vector<8x32xf32>
    %549 = arith.addf %545, %548 : vector<8x32xf32>
    %c7_i32_109 = arith.constant 7 : i32
    %550 = tpu.concatenate %510, %543 in 1 : vector<8x32xf32>, vector<8x32xf32> -> vector<8x64xf32>
    %551 = arith.truncf %550 : vector<8x64xf32> to vector<8x64xbf16>
    %cst_110 = arith.constant dense<0.000000e+00> : vector<8x256xf32>
    %552 = tpu.matmul %551, %7, %cst_110 {dimension_numbers = #tpu.dot_dimension_numbers<[1], [0], [0], [1], [0, 0, 1, 1], [], []>} : vector<8x64xbf16>, vector<64x256xbf16>, vector<8x256xf32> -> vector<8x256xf32>
    %553 = vector.broadcast %8 : vector<1x256xf32> to vector<8x256xf32>
    %554 = arith.addf %552, %553 : vector<8x256xf32>
    %c7_i32_111 = arith.constant 7 : i32
    %555 = arith.minsi %c7_i32_109, %c7_i32_111 : i32
    %c8_i32_112 = arith.constant 8 : i32
    %556 = arith.muli %555, %c8_i32_112 : i32
    %557 = tpu.assume_multiple %556, 8 : i32
    %558 = arith.index_cast %557 : i32 to index
    %c0_113 = arith.constant 0 : index
    %559 = vector.load %arg6[%558, %c0_113] : memref<64x128xf32, #tpu.memory_space<vmem>>, vector<8x128xf32>
    %560 = vector.extract_strided_slice %554 {offsets = [0, 0], sizes = [8, 128], strides = [1, 1]} : vector<8x256xf32> to vector<8x128xf32>
    %561 = arith.addf %560, %559 : vector<8x128xf32>
    %562 = arith.negf %561 : vector<8x128xf32>
    %563 = math.exp %562 : vector<8x128xf32>
    %cst_114 = arith.constant 1.000000e+00 : f32
    %564 = vector.broadcast %cst_114 : f32 to vector<8x128xf32>
    %565 = arith.addf %564, %563 : vector<8x128xf32>
    %566 = arith.divf %564, %565 : vector<8x128xf32>
    %567 = math.tanh %561 : vector<8x128xf32>
    %568 = vector.extract_strided_slice %566 {offsets = [0, 0], sizes = [8, 32], strides = [1, 1]} : vector<8x128xf32> to vector<8x32xf32>
    %569 = vector.extract_strided_slice %566 {offsets = [0, 32], sizes = [8, 32], strides = [1, 1]} : vector<8x128xf32> to vector<8x32xf32>
    %570 = vector.extract_strided_slice %566 {offsets = [0, 96], sizes = [8, 32], strides = [1, 1]} : vector<8x128xf32> to vector<8x32xf32>
    %571 = vector.extract_strided_slice %567 {offsets = [0, 64], sizes = [8, 32], strides = [1, 1]} : vector<8x128xf32> to vector<8x32xf32>
    %572 = arith.mulf %569, %516 : vector<8x32xf32>
    %573 = arith.mulf %568, %571 : vector<8x32xf32>
    %574 = arith.addf %572, %573 : vector<8x32xf32>
    %575 = math.tanh %574 : vector<8x32xf32>
    %576 = arith.mulf %570, %575 : vector<8x32xf32>
    %c0_i32_115 = arith.constant 0 : i32
    %577 = arith.cmpi sge, %c7_i32_109, %c0_i32_115 : i32
    %c7_i32_116 = arith.constant 7 : i32
    %578 = arith.cmpi sle, %c7_i32_109, %c7_i32_116 : i32
    %579 = arith.andi %577, %578 : i1
    %580 = arith.extui %579 : i1 to i32
    %581 = arith.sitofp %580 : i32 to f32
    %582 = vector.broadcast %581 : f32 to vector<8x32xf32>
    %583 = arith.mulf %582, %576 : vector<8x32xf32>
    %cst_117 = arith.constant 1.000000e+00 : f32
    %584 = arith.subf %cst_117, %581 : f32
    %585 = vector.broadcast %584 : f32 to vector<8x32xf32>
    %586 = arith.mulf %585, %510 : vector<8x32xf32>
    %587 = arith.addf %583, %586 : vector<8x32xf32>
    %588 = vector.broadcast %581 : f32 to vector<8x32xf32>
    %589 = arith.mulf %588, %574 : vector<8x32xf32>
    %cst_118 = arith.constant 1.000000e+00 : f32
    %590 = arith.subf %cst_118, %581 : f32
    %591 = vector.broadcast %590 : f32 to vector<8x32xf32>
    %592 = arith.mulf %591, %516 : vector<8x32xf32>
    %593 = arith.addf %589, %592 : vector<8x32xf32>
    %594 = vector.extract_strided_slice %554 {offsets = [0, 128], sizes = [8, 128], strides = [1, 1]} : vector<8x256xf32> to vector<8x128xf32>
    %595 = arith.negf %594 : vector<8x128xf32>
    %596 = math.exp %595 : vector<8x128xf32>
    %cst_119 = arith.constant 1.000000e+00 : f32
    %597 = vector.broadcast %cst_119 : f32 to vector<8x128xf32>
    %598 = arith.addf %597, %596 : vector<8x128xf32>
    %599 = arith.divf %597, %598 : vector<8x128xf32>
    %600 = math.tanh %594 : vector<8x128xf32>
    %601 = vector.extract_strided_slice %599 {offsets = [0, 0], sizes = [8, 32], strides = [1, 1]} : vector<8x128xf32> to vector<8x32xf32>
    %602 = vector.extract_strided_slice %599 {offsets = [0, 32], sizes = [8, 32], strides = [1, 1]} : vector<8x128xf32> to vector<8x32xf32>
    %603 = vector.extract_strided_slice %599 {offsets = [0, 96], sizes = [8, 32], strides = [1, 1]} : vector<8x128xf32> to vector<8x32xf32>
    %604 = vector.extract_strided_slice %600 {offsets = [0, 64], sizes = [8, 32], strides = [1, 1]} : vector<8x128xf32> to vector<8x32xf32>
    %605 = arith.mulf %602, %549 : vector<8x32xf32>
    %606 = arith.mulf %601, %604 : vector<8x32xf32>
    %607 = arith.addf %605, %606 : vector<8x32xf32>
    %608 = math.tanh %607 : vector<8x32xf32>
    %609 = arith.mulf %603, %608 : vector<8x32xf32>
    %c1_i32_120 = arith.constant 1 : i32
    %610 = arith.cmpi sge, %c7_i32_109, %c1_i32_120 : i32
    %c8_i32_121 = arith.constant 8 : i32
    %611 = arith.cmpi sle, %c7_i32_109, %c8_i32_121 : i32
    %612 = arith.andi %610, %611 : i1
    %613 = arith.extui %612 : i1 to i32
    %614 = arith.sitofp %613 : i32 to f32
    %615 = vector.broadcast %614 : f32 to vector<8x32xf32>
    %616 = arith.mulf %615, %609 : vector<8x32xf32>
    %cst_122 = arith.constant 1.000000e+00 : f32
    %617 = arith.subf %cst_122, %614 : f32
    %618 = vector.broadcast %617 : f32 to vector<8x32xf32>
    %619 = arith.mulf %618, %543 : vector<8x32xf32>
    %620 = arith.addf %616, %619 : vector<8x32xf32>
    %621 = vector.broadcast %614 : f32 to vector<8x32xf32>
    %622 = arith.mulf %621, %607 : vector<8x32xf32>
    %cst_123 = arith.constant 1.000000e+00 : f32
    %623 = arith.subf %cst_123, %614 : f32
    %624 = vector.broadcast %623 : f32 to vector<8x32xf32>
    %625 = arith.mulf %624, %549 : vector<8x32xf32>
    %626 = arith.addf %622, %625 : vector<8x32xf32>
    %c8_i32_124 = arith.constant 8 : i32
    %627 = tpu.concatenate %587, %620 in 1 : vector<8x32xf32>, vector<8x32xf32> -> vector<8x64xf32>
    %628 = arith.truncf %627 : vector<8x64xf32> to vector<8x64xbf16>
    %cst_125 = arith.constant dense<0.000000e+00> : vector<8x256xf32>
    %629 = tpu.matmul %628, %7, %cst_125 {dimension_numbers = #tpu.dot_dimension_numbers<[1], [0], [0], [1], [0, 0, 1, 1], [], []>} : vector<8x64xbf16>, vector<64x256xbf16>, vector<8x256xf32> -> vector<8x256xf32>
    %630 = vector.broadcast %8 : vector<1x256xf32> to vector<8x256xf32>
    %631 = arith.addf %629, %630 : vector<8x256xf32>
    %c7_i32_126 = arith.constant 7 : i32
    %632 = arith.minsi %c8_i32_124, %c7_i32_126 : i32
    %c8_i32_127 = arith.constant 8 : i32
    %633 = arith.muli %632, %c8_i32_127 : i32
    %634 = tpu.assume_multiple %633, 8 : i32
    %635 = arith.index_cast %634 : i32 to index
    %c0_128 = arith.constant 0 : index
    %636 = vector.load %arg6[%635, %c0_128] : memref<64x128xf32, #tpu.memory_space<vmem>>, vector<8x128xf32>
    %637 = vector.extract_strided_slice %631 {offsets = [0, 0], sizes = [8, 128], strides = [1, 1]} : vector<8x256xf32> to vector<8x128xf32>
    %638 = arith.addf %637, %636 : vector<8x128xf32>
    %639 = arith.negf %638 : vector<8x128xf32>
    %640 = math.exp %639 : vector<8x128xf32>
    %cst_129 = arith.constant 1.000000e+00 : f32
    %641 = vector.broadcast %cst_129 : f32 to vector<8x128xf32>
    %642 = arith.addf %641, %640 : vector<8x128xf32>
    %643 = arith.divf %641, %642 : vector<8x128xf32>
    %644 = math.tanh %638 : vector<8x128xf32>
    %645 = vector.extract_strided_slice %643 {offsets = [0, 0], sizes = [8, 32], strides = [1, 1]} : vector<8x128xf32> to vector<8x32xf32>
    %646 = vector.extract_strided_slice %643 {offsets = [0, 32], sizes = [8, 32], strides = [1, 1]} : vector<8x128xf32> to vector<8x32xf32>
    %647 = vector.extract_strided_slice %643 {offsets = [0, 96], sizes = [8, 32], strides = [1, 1]} : vector<8x128xf32> to vector<8x32xf32>
    %648 = vector.extract_strided_slice %644 {offsets = [0, 64], sizes = [8, 32], strides = [1, 1]} : vector<8x128xf32> to vector<8x32xf32>
    %649 = arith.mulf %646, %593 : vector<8x32xf32>
    %650 = arith.mulf %645, %648 : vector<8x32xf32>
    %651 = arith.addf %649, %650 : vector<8x32xf32>
    %652 = math.tanh %651 : vector<8x32xf32>
    %653 = arith.mulf %647, %652 : vector<8x32xf32>
    %c0_i32_130 = arith.constant 0 : i32
    %654 = arith.cmpi sge, %c8_i32_124, %c0_i32_130 : i32
    %c7_i32_131 = arith.constant 7 : i32
    %655 = arith.cmpi sle, %c8_i32_124, %c7_i32_131 : i32
    %656 = arith.andi %654, %655 : i1
    %657 = arith.extui %656 : i1 to i32
    %658 = arith.sitofp %657 : i32 to f32
    %659 = vector.broadcast %658 : f32 to vector<8x32xf32>
    %660 = arith.mulf %659, %653 : vector<8x32xf32>
    %cst_132 = arith.constant 1.000000e+00 : f32
    %661 = arith.subf %cst_132, %658 : f32
    %662 = vector.broadcast %661 : f32 to vector<8x32xf32>
    %663 = arith.mulf %662, %587 : vector<8x32xf32>
    %664 = arith.addf %660, %663 : vector<8x32xf32>
    %665 = vector.broadcast %658 : f32 to vector<8x32xf32>
    %666 = arith.mulf %665, %651 : vector<8x32xf32>
    %cst_133 = arith.constant 1.000000e+00 : f32
    %667 = arith.subf %cst_133, %658 : f32
    %668 = vector.broadcast %667 : f32 to vector<8x32xf32>
    %669 = arith.mulf %668, %593 : vector<8x32xf32>
    %670 = arith.addf %666, %669 : vector<8x32xf32>
    %671 = vector.extract_strided_slice %631 {offsets = [0, 128], sizes = [8, 128], strides = [1, 1]} : vector<8x256xf32> to vector<8x128xf32>
    %672 = arith.negf %671 : vector<8x128xf32>
    %673 = math.exp %672 : vector<8x128xf32>
    %cst_134 = arith.constant 1.000000e+00 : f32
    %674 = vector.broadcast %cst_134 : f32 to vector<8x128xf32>
    %675 = arith.addf %674, %673 : vector<8x128xf32>
    %676 = arith.divf %674, %675 : vector<8x128xf32>
    %677 = math.tanh %671 : vector<8x128xf32>
    %678 = vector.extract_strided_slice %676 {offsets = [0, 0], sizes = [8, 32], strides = [1, 1]} : vector<8x128xf32> to vector<8x32xf32>
    %679 = vector.extract_strided_slice %676 {offsets = [0, 32], sizes = [8, 32], strides = [1, 1]} : vector<8x128xf32> to vector<8x32xf32>
    %680 = vector.extract_strided_slice %676 {offsets = [0, 96], sizes = [8, 32], strides = [1, 1]} : vector<8x128xf32> to vector<8x32xf32>
    %681 = vector.extract_strided_slice %677 {offsets = [0, 64], sizes = [8, 32], strides = [1, 1]} : vector<8x128xf32> to vector<8x32xf32>
    %682 = arith.mulf %679, %626 : vector<8x32xf32>
    %683 = arith.mulf %678, %681 : vector<8x32xf32>
    %684 = arith.addf %682, %683 : vector<8x32xf32>
    %685 = math.tanh %684 : vector<8x32xf32>
    %686 = arith.mulf %680, %685 : vector<8x32xf32>
    %c1_i32_135 = arith.constant 1 : i32
    %687 = arith.cmpi sge, %c8_i32_124, %c1_i32_135 : i32
    %c8_i32_136 = arith.constant 8 : i32
    %688 = arith.cmpi sle, %c8_i32_124, %c8_i32_136 : i32
    %689 = arith.andi %687, %688 : i1
    %690 = arith.extui %689 : i1 to i32
    %691 = arith.sitofp %690 : i32 to f32
    %692 = vector.broadcast %691 : f32 to vector<8x32xf32>
    %693 = arith.mulf %692, %686 : vector<8x32xf32>
    %cst_137 = arith.constant 1.000000e+00 : f32
    %694 = arith.subf %cst_137, %691 : f32
    %695 = vector.broadcast %694 : f32 to vector<8x32xf32>
    %696 = arith.mulf %695, %620 : vector<8x32xf32>
    %697 = arith.addf %693, %696 : vector<8x32xf32>
    %698 = vector.broadcast %691 : f32 to vector<8x32xf32>
    %699 = arith.mulf %698, %684 : vector<8x32xf32>
    %cst_138 = arith.constant 1.000000e+00 : f32
    %700 = arith.subf %cst_138, %691 : f32
    %701 = vector.broadcast %700 : f32 to vector<8x32xf32>
    %702 = arith.mulf %701, %626 : vector<8x32xf32>
    %703 = arith.addf %699, %702 : vector<8x32xf32>
    %c9_i32 = arith.constant 9 : i32
    %704 = tpu.concatenate %664, %697, %670, %703 in 1 : vector<8x32xf32>, vector<8x32xf32>, vector<8x32xf32>, vector<8x32xf32> -> vector<8x128xf32>
    %c0_139 = arith.constant 0 : index
    %c0_140 = arith.constant 0 : index
    %705 = vector.load %arg5[%c0_139, %c0_140] : memref<8x128xf32, #tpu.memory_space<vmem>>, vector<8x128xf32>
    tpu.vector_store %arg5[%c0_139, %c0_140], %704 {strides = array<i32>} : memref<8x128xf32, #tpu.memory_space<vmem>>, vector<8x128xf32>,
    return
  }
}

</mosaic_0001>

<bundles_post_ra>
// kernel: encoder_forward.1
= control target key start
LH: loop header
LB: loop body
LE: loop exit
PB: predicated region body
PF: predicated region fallthrough
CT: control target
= control target key end

     0   :  { %v1476_v1 = vmov 0   ;;  %vm72_vm0 = vcmask 261120   ;;  %v1477_v13 = vmov 0.0|0.0   ;;  %v169_v14 = vlaneseq  ;;  %s1948_s3 = inlined_call_operand.vmem [shape: bf16[64,256], index: 3, kind: input, shape index: {}]   ;;  %s1949_s1 = inlined_call_operand.vmem [shape: bf16[32,128], index: 1, kind: input, shape index: {}]   ;;  %s1950_s0 = inlined_call_operand.vmem [shape: bf16[64,32], index: 0, kind: input, shape index: {}]   ;;  %s1951_s4 = inlined_call_operand.vmem [shape: f32[1,256], index: 4, kind: input, shape index: {}]   ;;  %s1952_s2 = inlined_call_operand.vmem [shape: f32[1,128], index: 2, kind: input, shape index: {}]   ;;  %s1953_s5 = inlined_call_operand.vmem [shape: f32[8,128], index: 5, kind: output, shape index: {}]  }
   0x1   :  { %v1513_v0 = vld [vmem:[%s1948_s3 + $0x4] ss:$8 sps:$4 sm:$0xff]   ;;  %255 = vmatprep.mubr.bf16.mxu1 %v1476_v1  ;;  %v1519_v2 = vld [vmem:[%s1948_s3] ss:$8 sps:$4 sm:$0xff]   ;;  %v1525_v3 = vld [vmem:[%s1948_s3 + $0x14] ss:$8 sps:$4 sm:$0xff]  }
   0x2   :  { %223 = vmatprep.subr.bf16.mxu1 %v1513_v0  ;;  %v1530_v4 = vld [vmem:[%s1948_s3 + $0x10] ss:$8 sps:$4 sm:$0xff]   ;;  %v1320_v5 = vld [vmem:[%s1949_s1] sm:$0xff]   ;;  %v1324_v7 = vld [vmem:[%s1949_s1 + $0x8] sm:$0xff]   ;;  %v170_v15 = vshrl.u32 %v169_v14, 7  ;;  %vm219_vm1 = vcmask 523264  }
   0x3   :  { %224 = vmatpush1.bf16.msra.mxu1 %v1519_v2  ;;  %v1540_v6 = vld [vmem:[%s1948_s3 + $0x24] ss:$8 sps:$4 sm:$0xff]   ;;  %1298 = vmatprep.subr.bf16.mxu0 %v1320_v5  ;;  %v1548_v8 = vld [vmem:[%s1948_s3 + $0x20] ss:$8 sps:$4 sm:$0xff]   ;;  %v1554_v9 = vld [vmem:[%s1948_s3 + $0x34] ss:$8 sps:$4 sm:$0xff]  }
   0x4   :  { %225 = vmatprep.subr.bf16.mxu1 %v1525_v3  ;;  %1299 = vmatpush3.bf16.msra.mxu0 %v1320_v5  ;;  %v1328_v10 = vld [vmem:[%s1950_s0] sm:$0xff]   ;;  %v1329_v11 = vld [vmem:[%s1950_s0 + $0x8] sm:$0xff]   ;;  %v1568_v12 = vld [vmem:[%s1948_s3 + $0x30] ss:$8 sps:$4 sm:$0xff]   ;;  %v171_v16 = vsub.s32 0, %v170_v15  ;;  %v175_v18 = vsub.s32 1, %v170_v15 }
   0x5   :  { %1300 = vmatprep.subr.bf16.mxu0 %v1324_v7  ;;  %1302 = vmatprep.mubr.msk.bf16.mxu0 %vm72_vm0, %v1328_v10  ;;  %v166_v17 = vld [vmem:[%s1951_s4] sm:$0x3]  ;;  %s1479_s4 = smov 32   ;;  %v1330_v54 = vld [vmem:[%s1950_s0 + $0x10] sm:$0xff]   ;;  %v1331_v55 = vld [vmem:[%s1950_s0 + $0x18] sm:$0xff]   ;;  %vm1240_vm2 = vcmask 785408  }
   0x6   :  { %v1600_v20 = vld [vmem:[%s1952_s2] ss:$0 sm:$0xff]  ;;  %v1602_v22 = vrot.slane %v166_v17, %v171_v16  ;;  %v1606_v24 = vrot.slane %v166_v17, %v175_v18  ;;  %s1478_s2 = smov 64  }
   0x7   :  { %226 = vmatpush1.bf16.msra.mxu1 %v1530_v4 }
   0x8   :  { %227 = vmatprep.subr.bf16.mxu1 %v1540_v6  ;;  %1301 = vmatpush3.bf16.msra.mxu0 %v1324_v7 }
   0x9   :  { %333 = vmatprep.subr.bf16.mxu0 %v1513_v0 }
   0xb   :  { %228 = vmatpush1.bf16.msra.mxu1 %v1548_v8  ;;  %1303 = vmatmul.mubr.msk.bf16.vlgmr.msra.gmra.mrb[0].mxu0 %vm72_vm0, %v1329_v11 }
   0xc   :  { %229 = vmatprep.subr.bf16.mxu1 %v1554_v9  ;;  %334 = vmatpush1.bf16.msra.mxu0 %v1519_v2 }
   0xd   :  { %335 = vmatprep.subr.bf16.mxu0 %v1525_v3  ;;  %1306 = vmatprep.mubr.msk.bf16.mxu0 %vm72_vm0, %v1330_v54 }
   0xf   :  { %230 = vmatpush1.bf16.msra.mxu1 %v1568_v12 }
  0x10   :  { %446 = vmatprep.subr.bf16.mxu1 %v1513_v0  ;;  %336 = vmatpush1.bf16.msra.mxu0 %v1530_v4 }
  0x11   :  { %337 = vmatprep.subr.bf16.mxu0 %v1540_v6 }
  0x12   :  { %256 = vmatmul.mubr.bf16.vlgmr.msra.gmra.mrb[0].mxu1 %v1477_v13 }
  0x13   :  { %447 = vmatpush1.bf16.msra.mxu1 %v1519_v2  ;;  %478 = vmatprep.mubr.bf16.mxu1 %v1476_v1 }
  0x14   :  { %448 = vmatprep.subr.bf16.mxu1 %v1525_v3  ;;  %338 = vmatpush1.bf16.msra.mxu0 %v1548_v8 }
  0x15   :  { %339 = vmatprep.subr.bf16.mxu0 %v1554_v9  ;;  %1307 = vmatmul.mubr.msk.bf16.gmra.mrb[4].mxu0 %vm72_vm0, %v1331_v55 }
  0x16   :  { %365 = vmatprep.mubr.bf16.mxu0 %v1476_v1 }
  0x17   :  { %449 = vmatpush1.bf16.msra.mxu1 %v1530_v4 }
  0x18   :  { %450 = vmatprep.subr.bf16.mxu1 %v1540_v6  ;;  %340 = vmatpush1.bf16.msra.mxu0 %v1568_v12 }
  0x19   :  { %559 = vmatprep.subr.bf16.mxu0 %v1513_v0 }
  0x1b   :  { %451 = vmatpush1.bf16.msra.mxu1 %v1548_v8 }
  0x1c   :  { %452 = vmatprep.subr.bf16.mxu1 %v1554_v9 }
  0x1f   :  { %453 = vmatpush1.bf16.msra.mxu1 %v1568_v12 }
  0x20   :  { %672 = vmatprep.subr.bf16.mxu1 %v1513_v0 }
  0xde   :  { %v1595_v19 = vpop.f32.mrb[0].mxu0 }
  0xdf   :  { %v119_v21 = vpop.f32.mrb[1].mxu0 }
  0xe0   :  { %v1604_v23 = vpop.f32.mrb[2].mxu0  ;;  %v120_v26 = vadd.f32 %v1600_v20, %v119_v21 }
  0xe1   :  { %v1608_v25 = vpop.f32.mrb[3].mxu0 }
  0xe2   :  { %v123_v17 = vadd.f32 %v1600_v20, %v1608_v25 }
  0xe5   :  { %v257_v27 = vpop.f32.mrb[0].mxu1 }
  0xe6   :  { %v258_v28 = vadd.f32 %v257_v27, %v1602_v22  ;;  %v259_v29 = vpop.f32.mrb[1].mxu1 }
  0xe7   :  { %v260_v30 = vadd.f32 %v259_v29, %v1606_v24  ;;  %v261_v31 = vpop.f32.mrb[2].mxu1 }
  0xe8   :  { %v265_v32 = vadd.f32 %v258_v28, %v120_v26  ;;  %v262_v33 = vpop.f32.mrb[3].mxu1  ;;  %v1642_v63 = vpop.f32.mrb[4].mxu0 }
  0xe9   :  { %1332 = vtanh.f32 %v260_v30  ;;  %v1267_v36 = vmul.f32 -1.442695, %v260_v30  ;;  %v1644_v5 = vpop.f32.mrb[5].mxu0 }
  0xea   :  { %1334 = vtanh.f32 %v265_v32  ;;  %v1266_v37 = vmul.f32 -1.442695, %v265_v32  ;;  %v1646_v7 = vpop.f32.mrb[6].mxu0 }
  0xeb   :  { %1336 = vpow2.f32 %v1267_v36  ;;  %v1648_v10 = vpop.f32.mrb[7].mxu0 }
  0xec   :  { %1338 = vpow2.f32 %v1266_v37 }
  0xf3   :  { %v1333_v34 = vpop.eup %1332 }
  0xf4   :  { %301 = vrot.lane.b32.xlu0 %v1333_v34, %s1478_s2  ;;  %v1335_v35 = vpop.eup %1334 }
  0xf5   :  { %v1337_v38 = vpop.eup %1336 }
  0xf6   :  { %v295_v39 = vadd.f32 1.0, %v1337_v38  ;;  %v1339_v40 = vpop.eup %1338 }
  0xf7   :  { %v269_v41 = vadd.f32 1.0, %v1339_v40 }
  0xf8   :  { %275 = vrot.lane.b32.xlu0 %v1335_v35, %s1478_s2  ;;  %1340 = vrcp.f32 %v295_v39 }
  0xf9   :  { %1342 = vrcp.f32 %v269_v41 }
 0x102   :  { %v1341_v42 = vpop.eup %1340 }
 0x103   :  { %v1343_v45 = vpop.eup %1342  ;;  %v299_v48 = vmul.f32 0.0, %v1341_v42 }
 0x104   :  { %v273_v51 = vmul.f32 0.0, %v1343_v45 }
 0x166   :  { %v302_v43 = vpop.permute.xlu0 %301 }
 0x167   :  { %v304_v44 = vmul.f32 %v1341_v42, %v302_v43 }
 0x169   :  { %306 = vrot.lane.b32.xlu1 %v304_v44, %s1479_s4 }
 0x16a   :  { %v276_v46 = vpop.permute.xlu0 %275 }
 0x16b   :  { %v278_v47 = vmul.f32 %v1343_v45, %v276_v46 }
 0x16d   :  { %280 = vrot.lane.b32.xlu1 %v278_v47, %s1479_s4 }
 0x1db   :  { %v307_v49 = vpop.permute.xlu1 %306 }
 0x1dc   :  { %v1617_v50 = vadd.f32 %v307_v49, %v299_v48 }
 0x1de   :  { %1344 = vtanh.f32 %v1617_v50  ;;  %v1670_v43 = vmul.f32 0.0, %v1617_v50 }
 0x1df   :  { %v281_v52 = vpop.permute.xlu1 %280 }
 0x1e0   :  { %v1620_v53 = vadd.f32 %v281_v52, %v273_v51 }
 0x1e2   :  { %1346 = vtanh.f32 %v1620_v53 }
 0x1e8   :  { %v1345_v56 = vpop.eup %1344 }
 0x1e9   :  { %312 = vrot.lane.b32.xlu0 %v1345_v56, %s1478_s2 }
 0x1ec   :  { %v1347_v57 = vpop.eup %1346 }
 0x1ed   :  { %286 = vrot.lane.b32.xlu1 %v1347_v57, %s1478_s2 }
 0x25b   :  { %v313_v58 = vpop.permute.xlu0 %312 }
 0x25c   :  { %v315_v59 = vmul.f32 %v1341_v42, %v313_v58 }
 0x25e   :  { %v1634_v60 = vmul.f32 0.0, %v315_v59 }
 0x25f   :  { %v287_v61 = vpop.permute.xlu1 %286 }
 0x260   :  { %v1636_v62 = vmul.f32 %v1343_v45, %v287_v61  ;;  %325 = vrot.lane.b32.xlu1 %v1634_v60, %s1478_s2  ;;  %v429_v54 = vmul.f32 0.0, %v1634_v60 }
 0x262   :  { %321 = vrot.lane.b32.xlu0 %v1636_v62, %s1479_s4  ;;  %v401_v57 = vmul.f32 0.0, %v1636_v62 }
 0x2d2   :  { %v326_v11 = vpop.permute.xlu1 %325 }
 0x2d4   :  { %v322_v13 = vpop.permute.xlu0 %321 }
 0x2d5   :  { %v328_v14 = vsel %vm72_vm0, %v322_v13, %v326_v11 }
 0x2d6   :  { %v329_v15 = vpack.c.bf16 %v328_v14, %v328_v14 }
 0x2d8   :  { %1268 = vmatmul.mubr.msk.bf16.vlgmr.msra.gmra.mrb[8].mxu0 %vm219_vm1, %v329_v15  ;;  %v128_v15 = vadd.f32 %v1595_v19, %v1600_v20 }
 0x2d9   :  { %560 = vmatpush1.bf16.msra.mxu0 %v1519_v2  ;;  %591 = vmatprep.mubr.bf16.mxu0 %v1476_v1 }
 0x2da   :  { %561 = vmatprep.subr.bf16.mxu0 %v1525_v3 }
 0x2dd   :  { %562 = vmatpush1.bf16.msra.mxu0 %v1530_v4 }
 0x2de   :  { %563 = vmatprep.subr.bf16.mxu0 %v1540_v6 }
 0x2e1   :  { %564 = vmatpush1.bf16.msra.mxu0 %v1548_v8 }
 0x2e2   :  { %565 = vmatprep.subr.bf16.mxu0 %v1554_v9 }
 0x2e5   :  { %566 = vmatpush1.bf16.msra.mxu0 %v1568_v12 }
 0x2e6   :  { %785 = vmatprep.subr.bf16.mxu0 %v1513_v0 }
 0x3ab   :  { %v367_v16 = vpop.f32.mrb[8].mxu0 }
 0x3ac   :  { %v368_v18 = vadd.f32 %v367_v16, %v1602_v22  ;;  %v369_v21 = vpop.f32.mrb[9].mxu0 }
 0x3ad   :  { %v370_v26 = vadd.f32 %v369_v21, %v1606_v24  ;;  %v371_v27 = vpop.f32.mrb[10].mxu0 }
 0x3ae   :  { %v376_v28 = vadd.f32 %v368_v18, %v123_v17  ;;  %v372_v29 = vpop.f32.mrb[11].mxu0 }
 0x3af   :  { %1348 = vtanh.f32 %v370_v26  ;;  %v1270_v32 = vmul.f32 -1.442695, %v370_v26 }
 0x3b0   :  { %1350 = vtanh.f32 %v376_v28  ;;  %v1269_v33 = vmul.f32 -1.442695, %v376_v28 }
 0x3b1   :  { %1352 = vpow2.f32 %v1270_v32 }
 0x3b2   :  { %1354 = vpow2.f32 %v1269_v33 }
 0x3b9   :  { %v1349_v30 = vpop.eup %1348 }
 0x3ba   :  { %v1351_v31 = vpop.eup %1350  ;;  %414 = vrot.lane.b32.xlu1 %v1349_v30, %s1478_s2 }
 0x3bb   :  { %386 = vrot.lane.b32.xlu0 %v1351_v31, %s1478_s2  ;;  %v1353_v25 = vpop.eup %1352 }
 0x3bc   :  { %v1355_v34 = vpop.eup %1354  ;;  %v408_v35 = vadd.f32 1.0, %v1353_v25 }
 0x3bd   :  { %v380_v36 = vadd.f32 1.0, %v1355_v34 }
 0x3be   :  { %1356 = vrcp.f32 %v408_v35 }
 0x3bf   :  { %1358 = vrcp.f32 %v380_v36 }
 0x3c8   :  { %v1357_v37 = vpop.eup %1356 }
 0x3c9   :  { %v1359_v39 = vpop.eup %1358  ;;  %v412_v44 = vmul.f32 %v1357_v37, %v1670_v43 }
 0x3ca   :  { %v384_v46 = vmul.f32 %v1359_v39, %v1620_v53 }
 0x42c   :  { %v415_v38 = vpop.permute.xlu1 %414 }
 0x42d   :  { %v417_v40 = vmul.f32 %v1357_v37, %v415_v38  ;;  %v387_v41 = vpop.permute.xlu0 %386 }
 0x42e   :  { %v389_v42 = vmul.f32 %v1359_v39, %v387_v41  ;;  %v403_v41 = vmul.f32 0.0, %v1620_v53 }
 0x42f   :  { %419 = vrot.lane.b32.xlu1 %v417_v40, %s1479_s4  ;;  %v431_v40 = vmul.f32 0.0, %v1670_v43 }
 0x430   :  { %391 = vrot.lane.b32.xlu0 %v389_v42, %s1479_s4 }
 0x4a1   :  { %v420_v45 = vpop.permute.xlu1 %419 }
 0x4a2   :  { %v1674_v47 = vadd.f32 %v420_v45, %v412_v44  ;;  %v392_v48 = vpop.permute.xlu0 %391 }
 0x4a3   :  { %v1676_v49 = vadd.f32 %v392_v48, %v384_v46 }
 0x4a4   :  { %1360 = vtanh.f32 %v1674_v47  ;;  %v1714_v42 = vadd.f32 %v431_v40, %v1674_v47 }
 0x4a5   :  { %1362 = vtanh.f32 %v1676_v49  ;;  %v1717_v44 = vadd.f32 %v403_v41, %v1676_v49 }
 0x4ae   :  { %v1361_v51 = vpop.eup %1360 }
 0x4af   :  { %v1363_v52 = vpop.eup %1362  ;;  %425 = vrot.lane.b32.xlu1 %v1361_v51, %s1478_s2 }
 0x4b0   :  { %397 = vrot.lane.b32.xlu0 %v1363_v52, %s1478_s2 }
 0x521   :  { %v426_v50 = vpop.permute.xlu1 %425 }
 0x522   :  { %v428_v55 = vmul.f32 %v1357_v37, %v426_v50  ;;  %v398_v56 = vpop.permute.xlu0 %397 }
 0x523   :  { %v400_v58 = vmul.f32 %v1359_v39, %v398_v56 }
 0x524   :  { %v1684_v59 = vadd.f32 %v429_v54, %v428_v55 }
 0x525   :  { %v1686_v61 = vadd.f32 %v401_v57, %v400_v58 }
 0x526   :  { %438 = vrot.lane.b32.xlu1 %v1684_v59, %s1478_s2  ;;  %v542_v49 = vmul.f32 0.0, %v1684_v59 }
 0x527   :  { %434 = vrot.lane.b32.xlu0 %v1686_v61, %s1479_s4  ;;  %v514_v57 = vmul.f32 0.0, %v1686_v61 }
 0x598   :  { %v439_v11 = vpop.permute.xlu1 %438 }
 0x599   :  { %v435_v13 = vpop.permute.xlu0 %434 }
 0x59a   :  { %v441_v14 = vsel %vm72_vm0, %v435_v13, %v439_v11 }
 0x59b   :  { %v442_v60 = vpack.c.bf16 %v441_v14, %v441_v14 }
 0x59d   :  { %1271 = vmatmul.mubr.msk.bf16.vlgmr.msra.gmra.mrb[4].mxu1 %vm219_vm1, %v442_v60 }
 0x59e   :  { %673 = vmatpush1.bf16.msra.mxu1 %v1519_v2  ;;  %704 = vmatprep.mubr.bf16.mxu1 %v1476_v1 }
 0x59f   :  { %674 = vmatprep.subr.bf16.mxu1 %v1525_v3 }
 0x5a2   :  { %675 = vmatpush1.bf16.msra.mxu1 %v1530_v4 }
 0x5a3   :  { %676 = vmatprep.subr.bf16.mxu1 %v1540_v6 }
 0x5a6   :  { %677 = vmatpush1.bf16.msra.mxu1 %v1548_v8 }
 0x5a7   :  { %678 = vmatprep.subr.bf16.mxu1 %v1554_v9 }
 0x5aa   :  { %679 = vmatpush1.bf16.msra.mxu1 %v1568_v12 }
 0x5ab   :  { %898 = vmatprep.subr.bf16.mxu1 %v1513_v0 }
 0x670   :  { %v480_v62 = vpop.f32.mrb[4].mxu1 }
 0x671   :  { %v481_v16 = vadd.f32 %v480_v62, %v1602_v22  ;;  %v482_v17 = vpop.f32.mrb[5].mxu1  ;;  %v131_v62 = vadd.f32 %v1604_v23, %v1600_v20 }
 0x672   :  { %v483_v18 = vadd.f32 %v482_v17, %v1606_v24  ;;  %v484_v21 = vpop.f32.mrb[6].mxu1 }
 0x673   :  { %v489_v26 = vadd.f32 %v481_v16, %v128_v15  ;;  %v485_v27 = vpop.f32.mrb[7].mxu1 }
 0x674   :  { %1364 = vtanh.f32 %v483_v18  ;;  %v1273_v30 = vmul.f32 -1.442695, %v483_v18 }
 0x675   :  { %1366 = vtanh.f32 %v489_v26  ;;  %v1272_v31 = vmul.f32 -1.442695, %v489_v26 }
 0x676   :  { %1368 = vpow2.f32 %v1273_v30 }
 0x677   :  { %1370 = vpow2.f32 %v1272_v31 }
 0x67e   :  { %v1365_v28 = vpop.eup %1364 }
 0x67f   :  { %v1367_v29 = vpop.eup %1366  ;;  %527 = vrot.lane.b32.xlu1 %v1365_v28, %s1478_s2 }
 0x680   :  { %499 = vrot.lane.b32.xlu0 %v1367_v29, %s1478_s2  ;;  %v1369_v19 = vpop.eup %1368 }
 0x681   :  { %v1371_v32 = vpop.eup %1370  ;;  %v521_v33 = vadd.f32 1.0, %v1369_v19 }
 0x682   :  { %v493_v25 = vadd.f32 1.0, %v1371_v32 }
 0x683   :  { %1372 = vrcp.f32 %v521_v33 }
 0x684   :  { %1374 = vrcp.f32 %v493_v25 }
 0x68d   :  { %v1373_v34 = vpop.eup %1372 }
 0x68e   :  { %v1375_v36 = vpop.eup %1374  ;;  %v525_v45 = vmul.f32 %v1373_v34, %v1714_v42 }
 0x68f   :  { %v497_v48 = vmul.f32 %v1375_v36, %v1717_v44 }
 0x6f1   :  { %v528_v35 = vpop.permute.xlu1 %527 }
 0x6f2   :  { %v530_v37 = vmul.f32 %v1373_v34, %v528_v35  ;;  %v500_v38 = vpop.permute.xlu0 %499 }
 0x6f3   :  { %v502_v39 = vmul.f32 %v1375_v36, %v500_v38  ;;  %v544_v38 = vmul.f32 0.0, %v1714_v42 }
 0x6f4   :  { %532 = vrot.lane.b32.xlu1 %v530_v37, %s1479_s4 }
 0x6f5   :  { %504 = vrot.lane.b32.xlu0 %v502_v39, %s1479_s4  ;;  %v516_v39 = vmul.f32 0.0, %v1717_v44 }
 0x766   :  { %v533_v46 = vpop.permute.xlu1 %532 }
 0x767   :  { %v1721_v51 = vadd.f32 %v533_v46, %v525_v45  ;;  %v505_v52 = vpop.permute.xlu0 %504 }
 0x768   :  { %v1723_v50 = vadd.f32 %v505_v52, %v497_v48 }
 0x769   :  { %1376 = vtanh.f32 %v1721_v51  ;;  %v1761_v40 = vadd.f32 %v544_v38, %v1721_v51 }
 0x76a   :  { %1378 = vtanh.f32 %v1723_v50  ;;  %v1764_v41 = vadd.f32 %v516_v39, %v1723_v50 }
 0x773   :  { %v1377_v53 = vpop.eup %1376 }
 0x774   :  { %v1379_v43 = vpop.eup %1378  ;;  %538 = vrot.lane.b32.xlu1 %v1377_v53, %s1478_s2 }
 0x775   :  { %510 = vrot.lane.b32.xlu0 %v1379_v43, %s1478_s2 }
 0x7e6   :  { %v539_v47 = vpop.permute.xlu1 %538 }
 0x7e7   :  { %v541_v54 = vmul.f32 %v1373_v34, %v539_v47  ;;  %v511_v55 = vpop.permute.xlu0 %510 }
 0x7e8   :  { %v513_v56 = vmul.f32 %v1375_v36, %v511_v55 }
 0x7e9   :  { %v1731_v58 = vadd.f32 %v542_v49, %v541_v54 }
 0x7ea   :  { %v1733_v11 = vadd.f32 %v514_v57, %v513_v56 }
 0x7eb   :  { %551 = vrot.lane.b32.xlu1 %v1731_v58, %s1478_s2  ;;  %v655_v50 = vmul.f32 0.0, %v1731_v58 }
 0x7ec   :  { %547 = vrot.lane.b32.xlu0 %v1733_v11, %s1479_s4  ;;  %v627_v55 = vmul.f32 0.0, %v1733_v11 }
 0x85d   :  { %v552_v13 = vpop.permute.xlu1 %551 }
 0x85e   :  { %v548_v14 = vpop.permute.xlu0 %547 }
 0x85f   :  { %v554_v60 = vsel %vm72_vm0, %v548_v14, %v552_v13 }
 0x860   :  { %v555_v59 = vpack.c.bf16 %v554_v60, %v554_v60 }
 0x862   :  { %1274 = vmatmul.mubr.msk.bf16.vlgmr.msra.gmra.mrb[12].mxu0 %vm219_vm1, %v555_v59  ;;  %v136_v59 = vadd.f32 %v1600_v20, %v1644_v5 }
 0x863   :  { %786 = vmatpush1.bf16.msra.mxu0 %v1519_v2  ;;  %817 = vmatprep.mubr.bf16.mxu0 %v1476_v1 }
 0x864   :  { %787 = vmatprep.subr.bf16.mxu0 %v1525_v3 }
 0x867   :  { %788 = vmatpush1.bf16.msra.mxu0 %v1530_v4 }
 0x868   :  { %789 = vmatprep.subr.bf16.mxu0 %v1540_v6 }
 0x86b   :  { %790 = vmatpush1.bf16.msra.mxu0 %v1548_v8 }
 0x86c   :  { %791 = vmatprep.subr.bf16.mxu0 %v1554_v9 }
 0x86f   :  { %792 = vmatpush1.bf16.msra.mxu0 %v1568_v12 }
 0x870   :  { %1011 = vmatprep.subr.bf16.mxu0 %v1513_v0 }
 0x935   :  { %v593_v61 = vpop.f32.mrb[12].mxu0 }
 0x936   :  { %v594_v15 = vadd.f32 %v593_v61, %v1602_v22  ;;  %v595_v16 = vpop.f32.mrb[13].mxu0 }
 0x937   :  { %v596_v17 = vadd.f32 %v595_v16, %v1606_v24  ;;  %v597_v18 = vpop.f32.mrb[14].mxu0 }
 0x938   :  { %v602_v21 = vadd.f32 %v594_v15, %v131_v62  ;;  %v598_v26 = vpop.f32.mrb[15].mxu0 }
 0x939   :  { %1380 = vtanh.f32 %v596_v17  ;;  %v1276_v29 = vmul.f32 -1.442695, %v596_v17 }
 0x93a   :  { %1382 = vtanh.f32 %v602_v21  ;;  %v1275_v30 = vmul.f32 -1.442695, %v602_v21 }
 0x93b   :  { %1384 = vpow2.f32 %v1276_v29 }
 0x93c   :  { %1386 = vpow2.f32 %v1275_v30 }
 0x943   :  { %v1381_v27 = vpop.eup %1380 }
 0x944   :  { %v1383_v28 = vpop.eup %1382  ;;  %640 = vrot.lane.b32.xlu1 %v1381_v27, %s1478_s2 }
 0x945   :  { %612 = vrot.lane.b32.xlu0 %v1383_v28, %s1478_s2  ;;  %v1385_v23 = vpop.eup %1384 }
 0x946   :  { %v1387_v31 = vpop.eup %1386  ;;  %v634_v19 = vadd.f32 1.0, %v1385_v23 }
 0x947   :  { %v606_v32 = vadd.f32 1.0, %v1387_v31 }
 0x948   :  { %1388 = vrcp.f32 %v634_v19 }
 0x949   :  { %1390 = vrcp.f32 %v606_v32 }
 0x952   :  { %v1389_v33 = vpop.eup %1388 }
 0x953   :  { %v1391_v34 = vpop.eup %1390  ;;  %v638_v45 = vmul.f32 %v1389_v33, %v1761_v40 }
 0x954   :  { %v610_v48 = vmul.f32 %v1391_v34, %v1764_v41 }
 0x9b6   :  { %v641_v25 = vpop.permute.xlu1 %640 }
 0x9b7   :  { %v643_v35 = vmul.f32 %v1389_v33, %v641_v25  ;;  %v613_v36 = vpop.permute.xlu0 %612 }
 0x9b8   :  { %v615_v37 = vmul.f32 %v1391_v34, %v613_v36 }
 0x9b9   :  { %645 = vrot.lane.b32.xlu1 %v643_v35, %s1479_s4  ;;  %v629_v35 = vmul.f32 0.0, %v1764_v41 }
 0x9ba   :  { %617 = vrot.lane.b32.xlu0 %v615_v37, %s1479_s4 }
 0xa2b   :  { %v646_v46 = vpop.permute.xlu1 %645 }
 0xa2c   :  { %v1768_v52 = vadd.f32 %v646_v46, %v638_v45  ;;  %v618_v53 = vpop.permute.xlu0 %617 }
 0xa2d   :  { %v1770_v43 = vadd.f32 %v618_v53, %v610_v48 }
 0xa2e   :  { %1392 = vtanh.f32 %v1768_v52 }
 0xa2f   :  { %1394 = vtanh.f32 %v1770_v43  ;;  %v1811_v37 = vadd.f32 %v629_v35, %v1770_v43 }
 0xa38   :  { %v1393_v42 = vpop.eup %1392 }
 0xa39   :  { %v1395_v44 = vpop.eup %1394  ;;  %651 = vrot.lane.b32.xlu1 %v1393_v42, %s1478_s2 }
 0xa3a   :  { %623 = vrot.lane.b32.xlu0 %v1395_v44, %s1478_s2 }
 0xaab   :  { %v652_v51 = vpop.permute.xlu1 %651 }
 0xaac   :  { %v654_v47 = vmul.f32 %v1389_v33, %v652_v51  ;;  %v624_v49 = vpop.permute.xlu0 %623 }
 0xaad   :  { %v626_v54 = vmul.f32 %v1391_v34, %v624_v49  ;;  %v657_v34 = vmul.f32 0.0, %v1761_v40 }
 0xaae   :  { %v1778_v56 = vadd.f32 %v655_v50, %v654_v47 }
 0xaaf   :  { %v1780_v57 = vadd.f32 %v627_v55, %v626_v54  ;;  %v1808_v36 = vadd.f32 %v657_v34, %v1768_v52 }
 0xab0   :  { %664 = vrot.lane.b32.xlu1 %v1778_v56, %s1478_s2  ;;  %v768_v43 = vmul.f32 0.0, %v1778_v56 }
 0xab1   :  { %660 = vrot.lane.b32.xlu0 %v1780_v57, %s1479_s4  ;;  %v740_v50 = vmul.f32 0.0, %v1780_v57 }
 0xb22   :  { %v665_v13 = vpop.permute.xlu1 %664 }
 0xb23   :  { %v661_v14 = vpop.permute.xlu0 %660 }
 0xb24   :  { %v667_v60 = vsel %vm72_vm0, %v661_v14, %v665_v13  ;;  %v139_v14 = vadd.f32 %v1600_v20, %v1648_v10 }
 0xb25   :  { %v668_v58 = vpack.c.bf16 %v667_v60, %v667_v60 }
 0xb27   :  { %1277 = vmatmul.mubr.msk.bf16.vlgmr.msra.gmra.mrb[8].mxu1 %vm219_vm1, %v668_v58 }
 0xb28   :  { %899 = vmatpush1.bf16.msra.mxu1 %v1519_v2  ;;  %930 = vmatprep.mubr.bf16.mxu1 %v1476_v1 }
 0xb29   :  { %900 = vmatprep.subr.bf16.mxu1 %v1525_v3 }
 0xb2c   :  { %901 = vmatpush1.bf16.msra.mxu1 %v1530_v4 }
 0xb2d   :  { %902 = vmatprep.subr.bf16.mxu1 %v1540_v6 }
 0xb30   :  { %903 = vmatpush1.bf16.msra.mxu1 %v1548_v8 }
 0xb31   :  { %904 = vmatprep.subr.bf16.mxu1 %v1554_v9 }
 0xb34   :  { %905 = vmatpush1.bf16.msra.mxu1 %v1568_v12 }
 0xb35   :  { %1124 = vmatprep.subr.bf16.mxu1 %v1513_v0 }
 0xbfa   :  { %v706_v11 = vpop.f32.mrb[8].mxu1 }
 0xbfb   :  { %v707_v61 = vadd.f32 %v706_v11, %v1602_v22  ;;  %v708_v62 = vpop.f32.mrb[9].mxu1 }
 0xbfc   :  { %v709_v15 = vadd.f32 %v708_v62, %v1606_v24  ;;  %v710_v16 = vpop.f32.mrb[10].mxu1 }
 0xbfd   :  { %v715_v17 = vadd.f32 %v707_v61, %v136_v59  ;;  %v711_v18 = vpop.f32.mrb[11].mxu1 }
 0xbfe   :  { %1396 = vtanh.f32 %v709_v15  ;;  %v1279_v0 = vmul.f32 -1.442695, %v709_v15 }
 0xbff   :  { %1398 = vtanh.f32 %v715_v17  ;;  %v1278_v27 = vmul.f32 -1.442695, %v715_v17 }
 0xc00   :  { %1400 = vpow2.f32 %v1279_v0 }
 0xc01   :  { %1402 = vpow2.f32 %v1278_v27 }
 0xc08   :  { %v1397_v21 = vpop.eup %1396 }
 0xc09   :  { %v1399_v26 = vpop.eup %1398  ;;  %753 = vrot.lane.b32.xlu1 %v1397_v21, %s1478_s2 }
 0xc0a   :  { %725 = vrot.lane.b32.xlu0 %v1399_v26, %s1478_s2  ;;  %v1401_v5 = vpop.eup %1400 }
 0xc0b   :  { %v1403_v28 = vpop.eup %1402  ;;  %v747_v29 = vadd.f32 1.0, %v1401_v5 }
 0xc0c   :  { %v719_v30 = vadd.f32 1.0, %v1403_v28 }
 0xc0d   :  { %1404 = vrcp.f32 %v747_v29 }
 0xc0e   :  { %1406 = vrcp.f32 %v719_v30 }
 0xc17   :  { %v1405_v23 = vpop.eup %1404 }
 0xc18   :  { %v1407_v19 = vpop.eup %1406  ;;  %v751_v38 = vmul.f32 %v1405_v23, %v1808_v36 }
 0xc19   :  { %v723_v45 = vmul.f32 %v1407_v19, %v1811_v37 }
 0xc7b   :  { %v754_v31 = vpop.permute.xlu1 %753 }
 0xc7c   :  { %v756_v32 = vmul.f32 %v1405_v23, %v754_v31  ;;  %v726_v33 = vpop.permute.xlu0 %725  ;;  %v770_v31 = vmul.f32 0.0, %v1808_v36 }
 0xc7d   :  { %v728_v25 = vmul.f32 %v1407_v19, %v726_v33 }
 0xc7e   :  { %758 = vrot.lane.b32.xlu1 %v756_v32, %s1479_s4 }
 0xc7f   :  { %730 = vrot.lane.b32.xlu0 %v728_v25, %s1479_s4 }
 0xcf0   :  { %v759_v39 = vpop.permute.xlu1 %758 }
 0xcf1   :  { %v1815_v46 = vadd.f32 %v759_v39, %v751_v38  ;;  %v731_v48 = vpop.permute.xlu0 %730 }
 0xcf2   :  { %v1817_v53 = vadd.f32 %v731_v48, %v723_v45 }
 0xcf3   :  { %1408 = vtanh.f32 %v1815_v46  ;;  %v1854_v32 = vadd.f32 %v770_v31, %v1815_v46 }
 0xcf4   :  { %1410 = vtanh.f32 %v1817_v53 }
 0xcfd   :  { %v1409_v40 = vpop.eup %1408 }
 0xcfe   :  { %v1411_v41 = vpop.eup %1410  ;;  %764 = vrot.lane.b32.xlu1 %v1409_v40, %s1478_s2 }
 0xcff   :  { %736 = vrot.lane.b32.xlu0 %v1411_v41, %s1478_s2 }
 0xd70   :  { %v765_v52 = vpop.permute.xlu1 %764 }
 0xd71   :  { %v767_v42 = vmul.f32 %v1405_v23, %v765_v52  ;;  %v737_v44 = vpop.permute.xlu0 %736 }
 0xd72   :  { %v739_v51 = vmul.f32 %v1407_v19, %v737_v44  ;;  %v742_v19 = vmul.f32 0.0, %v1811_v37 }
 0xd73   :  { %v1825_v47 = vadd.f32 %v768_v43, %v767_v42 }
 0xd74   :  { %v1827_v49 = vadd.f32 %v740_v50, %v739_v51  ;;  %v1857_v33 = vadd.f32 %v742_v19, %v1817_v53 }
 0xd75   :  { %777 = vrot.lane.b32.xlu1 %v1825_v47, %s1478_s2  ;;  %v881_v48 = vmul.f32 0.0, %v1825_v47 }
 0xd76   :  { %773 = vrot.lane.b32.xlu0 %v1827_v49, %s1479_s4  ;;  %v853_v52 = vmul.f32 0.0, %v1827_v49 }
 0xde7   :  { %v778_v54 = vpop.permute.xlu1 %777 }
 0xde8   :  { %v774_v55 = vpop.permute.xlu0 %773 }
 0xde9   :  { %v780_v13 = vsel %vm72_vm0, %v774_v55, %v778_v54  ;;  %v144_v54 = vadd.f32 %v1642_v63, %v1600_v20 }
 0xdea   :  { %v781_v56 = vpack.c.bf16 %v780_v13, %v780_v13 }
 0xdec   :  { %1280 = vmatmul.mubr.msk.bf16.vlgmr.msra.gmra.mrb[16].mxu0 %vm219_vm1, %v781_v56 }
 0xded   :  { %1012 = vmatpush1.bf16.msra.mxu0 %v1519_v2  ;;  %1043 = vmatprep.mubr.bf16.mxu0 %v1476_v1 }
 0xdee   :  { %1013 = vmatprep.subr.bf16.mxu0 %v1525_v3 }
 0xdf1   :  { %1014 = vmatpush1.bf16.msra.mxu0 %v1530_v4 }
 0xdf2   :  { %1015 = vmatprep.subr.bf16.mxu0 %v1540_v6 }
 0xdf5   :  { %1016 = vmatpush1.bf16.msra.mxu0 %v1548_v8 }
 0xdf6   :  { %1017 = vmatprep.subr.bf16.mxu0 %v1554_v9 }
 0xdf9   :  { %1018 = vmatpush1.bf16.msra.mxu0 %v1568_v12 }
 0xebf   :  { %v819_v57 = vpop.f32.mrb[16].mxu0 }
 0xec0   :  { %v820_v60 = vadd.f32 %v819_v57, %v1602_v22  ;;  %v821_v58 = vpop.f32.mrb[17].mxu0 }
 0xec1   :  { %v822_v11 = vadd.f32 %v821_v58, %v1606_v24  ;;  %v823_v59 = vpop.f32.mrb[18].mxu0 }
 0xec2   :  { %v828_v61 = vadd.f32 %v820_v60, %v139_v14  ;;  %v824_v62 = vpop.f32.mrb[19].mxu0 }
 0xec3   :  { %1412 = vtanh.f32 %v822_v11  ;;  %v1282_v17 = vmul.f32 -1.442695, %v822_v11 }
 0xec4   :  { %1414 = vtanh.f32 %v828_v61  ;;  %v1281_v18 = vmul.f32 -1.442695, %v828_v61 }
 0xec5   :  { %1416 = vpow2.f32 %v1282_v17 }
 0xec6   :  { %1418 = vpow2.f32 %v1281_v18 }
 0xecd   :  { %v1413_v15 = vpop.eup %1412 }
 0xece   :  { %v1415_v16 = vpop.eup %1414  ;;  %866 = vrot.lane.b32.xlu1 %v1413_v15, %s1478_s2  ;;  %v883_v15 = vmul.f32 0.0, %v1854_v32 }
 0xecf   :  { %838 = vrot.lane.b32.xlu0 %v1415_v16, %s1478_s2  ;;  %v1417_v10 = vpop.eup %1416  ;;  %v855_v16 = vmul.f32 0.0, %v1857_v33 }
 0xed0   :  { %v1419_v21 = vpop.eup %1418  ;;  %v860_v26 = vadd.f32 1.0, %v1417_v10 }
 0xed1   :  { %v832_v0 = vadd.f32 1.0, %v1419_v21 }
 0xed2   :  { %1420 = vrcp.f32 %v860_v26 }
 0xed3   :  { %1422 = vrcp.f32 %v832_v0 }
 0xedc   :  { %v1421_v27 = vpop.eup %1420 }
 0xedd   :  { %v1423_v28 = vpop.eup %1422  ;;  %v864_v25 = vmul.f32 %v1421_v27, %v1854_v32 }
 0xede   :  { %v836_v35 = vmul.f32 %v1423_v28, %v1857_v33 }
 0xf40   :  { %v867_v5 = vpop.permute.xlu1 %866 }
 0xf41   :  { %v869_v29 = vmul.f32 %v1421_v27, %v867_v5  ;;  %v839_v30 = vpop.permute.xlu0 %838 }
 0xf42   :  { %v841_v23 = vmul.f32 %v1423_v28, %v839_v30 }
 0xf43   :  { %871 = vrot.lane.b32.xlu1 %v869_v29, %s1479_s4 }
 0xf44   :  { %843 = vrot.lane.b32.xlu0 %v841_v23, %s1479_s4 }
 0xfb5   :  { %v872_v34 = vpop.permute.xlu1 %871 }
 0xfb6   :  { %v1861_v38 = vadd.f32 %v872_v34, %v864_v25  ;;  %v844_v39 = vpop.permute.xlu0 %843 }
 0xfb7   :  { %v1863_v45 = vadd.f32 %v844_v39, %v836_v35 }
 0xfb8   :  { %1424 = vtanh.f32 %v1861_v38  ;;  %v884_v17 = vadd.f32 %v883_v15, %v1861_v38 }
 0xfb9   :  { %1426 = vtanh.f32 %v1863_v45  ;;  %v856_v18 = vadd.f32 %v855_v16, %v1863_v45 }
 0xfc2   :  { %v1425_v36 = vpop.eup %1424 }
 0xfc3   :  { %v1427_v37 = vpop.eup %1426  ;;  %877 = vrot.lane.b32.xlu1 %v1425_v36, %s1478_s2 }
 0xfc4   :  { %849 = vrot.lane.b32.xlu0 %v1427_v37, %s1478_s2  ;;  %v1911_v37 = vadd.f32 %v1646_v7, %v1600_v20 }
0x1035   :  { %v878_v46 = vpop.permute.xlu1 %877 }
0x1036   :  { %v880_v53 = vmul.f32 %v1421_v27, %v878_v46  ;;  %v850_v40 = vpop.permute.xlu0 %849 }
0x1037   :  { %v852_v41 = vmul.f32 %v1423_v28, %v850_v40 }
0x1038   :  { %v1871_v43 = vadd.f32 %v881_v48, %v880_v53 }
0x1039   :  { %v1873_v42 = vadd.f32 %v853_v52, %v852_v41 }
0x103a   :  { %890 = vrot.lane.b32.xlu1 %v1871_v43, %s1478_s2  ;;  %v994_v23 = vmul.f32 0.0, %v1871_v43 }
0x103b   :  { %886 = vrot.lane.b32.xlu0 %v1873_v42, %s1479_s4  ;;  %v966_v33 = vmul.f32 0.0, %v1873_v42 }
0x10ac   :  { %v891_v44 = vpop.permute.xlu1 %890 }
0x10ad   :  { %v887_v51 = vpop.permute.xlu0 %886 }
0x10ae   :  { %v893_v50 = vsel %vm72_vm0, %v887_v51, %v891_v44 }
0x10af   :  { %v894_v47 = vpack.c.bf16 %v893_v50, %v893_v50 }
0x10b1   :  { %1283 = vmatmul.mubr.msk.bf16.vlgmr.msra.gmra.mrb[12].mxu1 %vm219_vm1, %v894_v47 }
0x10b2   :  { %1125 = vmatpush1.bf16.msra.mxu1 %v1519_v2  ;;  %1156 = vmatprep.mubr.bf16.mxu1 %v1476_v1 }
0x10b3   :  { %1126 = vmatprep.subr.bf16.mxu1 %v1525_v3 }
0x10b6   :  { %1127 = vmatpush1.bf16.msra.mxu1 %v1530_v4 }
0x10b7   :  { %1128 = vmatprep.subr.bf16.mxu1 %v1540_v6 }
0x10ba   :  { %1129 = vmatpush1.bf16.msra.mxu1 %v1548_v8 }
0x10bb   :  { %1130 = vmatprep.subr.bf16.mxu1 %v1554_v9 }
0x10be   :  { %1131 = vmatpush1.bf16.msra.mxu1 %v1568_v12 }
0x1184   :  { %v932_v49 = vpop.f32.mrb[12].mxu1 }
0x1185   :  { %v933_v2 = vadd.f32 %v932_v49, %v1602_v22  ;;  %v934_v55 = vpop.f32.mrb[13].mxu1 }
0x1186   :  { %v935_v1 = vadd.f32 %v934_v55, %v1606_v24  ;;  %v936_v3 = vpop.f32.mrb[14].mxu1 }
0x1187   :  { %v941_v13 = vadd.f32 %v933_v2, %v144_v54  ;;  %v937_v4 = vpop.f32.mrb[15].mxu1 }
0x1188   :  { %1428 = vtanh.f32 %v935_v1  ;;  %v1285_v9 = vmul.f32 -1.442695, %v935_v1  ;;  %v968_v4 = vmul.f32 0.0, %v856_v18 }
0x1189   :  { %1430 = vtanh.f32 %v941_v13  ;;  %v1284_v12 = vmul.f32 -1.442695, %v941_v13  ;;  %v996_v13 = vmul.f32 0.0, %v884_v17 }
0x118a   :  { %1432 = vpow2.f32 %v1285_v9 }
0x118b   :  { %1434 = vpow2.f32 %v1284_v12 }
0x1192   :  { %v1429_v6 = vpop.eup %1428 }
0x1193   :  { %v1431_v8 = vpop.eup %1430  ;;  %979 = vrot.lane.b32.xlu1 %v1429_v6, %s1478_s2 }
0x1194   :  { %951 = vrot.lane.b32.xlu0 %v1431_v8, %s1478_s2  ;;  %v1433_v63 = vpop.eup %1432 }
0x1195   :  { %v1435_v56 = vpop.eup %1434  ;;  %v973_v57 = vadd.f32 1.0, %v1433_v63 }
0x1196   :  { %v945_v14 = vadd.f32 1.0, %v1435_v56 }
0x1197   :  { %1436 = vrcp.f32 %v973_v57 }
0x1198   :  { %1438 = vrcp.f32 %v945_v14 }
0x11a1   :  { %v1437_v60 = vpop.eup %1436 }
0x11a2   :  { %v1439_v11 = vpop.eup %1438  ;;  %v977_v10 = vmul.f32 %v1437_v60, %v884_v17 }
0x11a3   :  { %v949_v26 = vmul.f32 %v1439_v11, %v856_v18 }
0x1205   :  { %v980_v58 = vpop.permute.xlu1 %979 }
0x1206   :  { %v982_v59 = vmul.f32 %v1437_v60, %v980_v58  ;;  %v952_v61 = vpop.permute.xlu0 %951 }
0x1207   :  { %v954_v62 = vmul.f32 %v1439_v11, %v952_v61 }
0x1208   :  { %984 = vrot.lane.b32.xlu1 %v982_v59, %s1479_s4 }
0x1209   :  { %956 = vrot.lane.b32.xlu0 %v954_v62, %s1479_s4 }
0x127a   :  { %v985_v21 = vpop.permute.xlu1 %984 }
0x127b   :  { %v987_v0 = vadd.f32 %v985_v21, %v977_v10  ;;  %v957_v27 = vpop.permute.xlu0 %956 }
0x127c   :  { %v959_v5 = vadd.f32 %v957_v27, %v949_v26 }
0x127d   :  { %1440 = vtanh.f32 %v987_v0  ;;  %v997_v6 = vadd.f32 %v996_v13, %v987_v0 }
0x127e   :  { %1442 = vtanh.f32 %v959_v5  ;;  %v969_v8 = vadd.f32 %v968_v4, %v959_v5 }
0x1287   :  { %v1441_v28 = vpop.eup %1440 }
0x1288   :  { %v1443_v29 = vpop.eup %1442  ;;  %990 = vrot.lane.b32.xlu1 %v1441_v28, %s1478_s2 }
0x1289   :  { %962 = vrot.lane.b32.xlu0 %v1443_v29, %s1478_s2 }
0x12fa   :  { %v991_v30 = vpop.permute.xlu1 %990 }
0x12fb   :  { %v993_v31 = vmul.f32 %v1437_v60, %v991_v30  ;;  %v963_v19 = vpop.permute.xlu0 %962 }
0x12fc   :  { %v965_v32 = vmul.f32 %v1439_v11, %v963_v19 }
0x12fd   :  { %v995_v25 = vadd.f32 %v994_v23, %v993_v31 }
0x12fe   :  { %v967_v34 = vadd.f32 %v966_v33, %v965_v32 }
0x12ff   :  { %1003 = vrot.lane.b32.xlu1 %v995_v25, %s1478_s2  ;;  %v1107_v59 = vmul.f32 0.0, %v995_v25 }
0x1300   :  { %999 = vrot.lane.b32.xlu0 %v967_v34, %s1479_s4  ;;  %v1079_v16 = vmul.f32 0.0, %v967_v34 }
0x1371   :  { %v1004_v35 = vpop.permute.xlu1 %1003 }
0x1372   :  { %v1000_v38 = vpop.permute.xlu0 %999 }
0x1373   :  { %v1006_v39 = vsel %vm72_vm0, %v1000_v38, %v1004_v35 }
0x1374   :  { %v1007_v45 = vpack.c.bf16 %v1006_v39, %v1006_v39 }
0x1376   :  { %1286 = vmatmul.mubr.msk.bf16.vlgmr.msra.gmra.mrb[20].mxu0 %vm219_vm1, %v1007_v45 }
0x1449   :  { %v1045_v36 = vpop.f32.mrb[20].mxu0 }
0x144a   :  { %v1046_v46 = vadd.f32 %v1045_v36, %v1602_v22  ;;  %v1047_v48 = vpop.f32.mrb[21].mxu0 }
0x144b   :  { %v1048_v53 = vadd.f32 %v1047_v48, %v1606_v24  ;;  %v1049_v40 = vpop.f32.mrb[22].mxu0  ;;  %v1109_v48 = vmul.f32 0.0, %v997_v6 }
0x144c   :  { %v1054_v41 = vadd.f32 %v1046_v46, %v1911_v37  ;;  %v1050_v52 = vpop.f32.mrb[23].mxu0 }
0x144d   :  { %1444 = vtanh.f32 %v1048_v53  ;;  %v1288_v44 = vmul.f32 -1.442695, %v1048_v53  ;;  %v1081_v53 = vmul.f32 0.0, %v969_v8 }
0x144e   :  { %1446 = vtanh.f32 %v1054_v41  ;;  %v1287_v20 = vmul.f32 -1.442695, %v1054_v41 }
0x144f   :  { %1448 = vpow2.f32 %v1288_v44 }
0x1450   :  { %1450 = vpow2.f32 %v1287_v20 }
0x1457   :  { %v1445_v43 = vpop.eup %1444 }
0x1458   :  { %v1447_v42 = vpop.eup %1446  ;;  %1092 = vrot.lane.b32.xlu1 %v1445_v43, %s1478_s2 }
0x1459   :  { %1064 = vrot.lane.b32.xlu0 %v1447_v42, %s1478_s2  ;;  %v1449_v7 = vpop.eup %1448 }
0x145a   :  { %v1451_v51 = vpop.eup %1450  ;;  %v1086_v50 = vadd.f32 1.0, %v1449_v7 }
0x145b   :  { %v1058_v47 = vadd.f32 1.0, %v1451_v51 }
0x145c   :  { %1452 = vrcp.f32 %v1086_v50 }
0x145d   :  { %1454 = vrcp.f32 %v1058_v47 }
0x1466   :  { %v1453_v49 = vpop.eup %1452 }
0x1467   :  { %v1455_v2 = vpop.eup %1454  ;;  %v1090_v9 = vmul.f32 %v1453_v49, %v997_v6 }
0x1468   :  { %v1062_v63 = vmul.f32 %v1455_v2, %v969_v8 }
0x14ca   :  { %v1093_v54 = vpop.permute.xlu1 %1092 }
0x14cb   :  { %v1095_v55 = vmul.f32 %v1453_v49, %v1093_v54  ;;  %v1065_v1 = vpop.permute.xlu0 %1064 }
0x14cc   :  { %v1067_v3 = vmul.f32 %v1455_v2, %v1065_v1 }
0x14cd   :  { %1097 = vrot.lane.b32.xlu1 %v1095_v55, %s1479_s4 }
0x14ce   :  { %1069 = vrot.lane.b32.xlu0 %v1067_v3, %s1479_s4 }
0x153f   :  { %v1098_v12 = vpop.permute.xlu1 %1097 }
0x1540   :  { %v1100_v56 = vadd.f32 %v1098_v12, %v1090_v9  ;;  %v1070_v57 = vpop.permute.xlu0 %1069 }
0x1541   :  { %v1072_v14 = vadd.f32 %v1070_v57, %v1062_v63 }
0x1542   :  { %1456 = vtanh.f32 %v1100_v56  ;;  %v1110_v40 = vadd.f32 %v1109_v48, %v1100_v56 }
0x1543   :  { %1458 = vtanh.f32 %v1072_v14  ;;  %v1082_v41 = vadd.f32 %v1081_v53, %v1072_v14 }
0x1544   :  { %v1220_v13 = vmul.f32 0.0, %v1110_v40 }
0x154c   :  { %v1457_v60 = vpop.eup %1456 }
0x154d   :  { %v1459_v58 = vpop.eup %1458  ;;  %1103 = vrot.lane.b32.xlu1 %v1457_v60, %s1478_s2 }
0x154e   :  { %1075 = vrot.lane.b32.xlu0 %v1459_v58, %s1478_s2 }
0x15bf   :  { %v1104_v11 = vpop.permute.xlu1 %1103 }
0x15c0   :  { %v1106_v61 = vmul.f32 %v1453_v49, %v1104_v11  ;;  %v1076_v62 = vpop.permute.xlu0 %1075 }
0x15c1   :  { %v1078_v15 = vmul.f32 %v1455_v2, %v1076_v62 }
0x15c2   :  { %v1108_v17 = vadd.f32 %v1107_v59, %v1106_v61 }
0x15c3   :  { %v1922_v18 = vadd.f32 %v1079_v16, %v1078_v15 }
0x15c4   :  { %1116 = vrot.lane.b32.xlu1 %v1108_v17, %s1478_s2  ;;  %v1218_v49 = vmul.f32 0.0, %v1108_v17 }
0x15c5   :  { %1112 = vrot.lane.b32.xlu0 %v1922_v18, %s1479_s4 }
0x1636   :  { %v1117_v10 = vpop.permute.xlu1 %1116 }
0x1637   :  { %v1113_v21 = vpop.permute.xlu0 %1112 }
0x1638   :  { %v1119_v26 = vsel %vm72_vm0, %v1113_v21, %v1117_v10 }
0x1639   :  { %v1120_v0 = vpack.c.bf16 %v1119_v26, %v1119_v26 }
0x163b   :  { %1289 = vmatmul.mubr.msk.bf16.vlgmr.msra.gmra.mrb[16].mxu1 %vm219_vm1, %v1120_v0 }
0x170e   :  { %v1158_v27 = vpop.f32.mrb[16].mxu1 }
0x170f   :  { %v1159_v5 = vadd.f32 %v1158_v27, %v1602_v22  ;;  %v1160_v28 = vpop.f32.mrb[17].mxu1 }
0x1710   :  { %v1161_v29 = vadd.f32 %v1160_v28, %v1606_v24  ;;  %v1162_v30 = vpop.f32.mrb[18].mxu1 }
0x1711   :  { %v1165_v23 = vadd.f32 %v1159_v5, %v1911_v37  ;;  %v1163_v31 = vpop.f32.mrb[19].mxu1 }
0x1712   :  { %1460 = vtanh.f32 %v1161_v29  ;;  %v1291_v33 = vmul.f32 -1.442695, %v1161_v29 }
0x1713   :  { %1462 = vtanh.f32 %v1165_v23  ;;  %v1290_v25 = vmul.f32 -1.442695, %v1165_v23 }
0x1714   :  { %1464 = vpow2.f32 %v1291_v33 }
0x1715   :  { %1466 = vpow2.f32 %v1290_v25 }
0x171c   :  { %v1461_v19 = vpop.eup %1460 }
0x171d   :  { %v1463_v32 = vpop.eup %1462  ;;  %1203 = vrot.lane.b32.xlu1 %v1461_v19, %s1478_s2 }
0x171e   :  { %1175 = vrot.lane.b32.xlu0 %v1463_v32, %s1478_s2  ;;  %v1465_v22 = vpop.eup %1464 }
0x171f   :  { %v1467_v34 = vpop.eup %1466  ;;  %v1197_v35 = vadd.f32 1.0, %v1465_v22 }
0x1720   :  { %v1169_v24 = vadd.f32 1.0, %v1467_v34 }
0x1721   :  { %1468 = vrcp.f32 %v1197_v35 }
0x1722   :  { %1470 = vrcp.f32 %v1169_v24 }
0x172b   :  { %v1469_v38 = vpop.eup %1468 }
0x172c   :  { %v1471_v45 = vpop.eup %1470  ;;  %v1201_v52 = vmul.f32 %v1469_v38, %v1110_v40 }
0x172d   :  { %v1173_v42 = vmul.f32 %v1471_v45, %v1082_v41 }
0x178f   :  { %v1204_v39 = vpop.permute.xlu1 %1203 }
0x1790   :  { %v1206_v36 = vmul.f32 %v1469_v38, %v1204_v39  ;;  %v1176_v37 = vpop.permute.xlu0 %1175 }
0x1791   :  { %v1178_v46 = vmul.f32 %v1471_v45, %v1176_v37 }
0x1792   :  { %1208 = vrot.lane.b32.xlu1 %v1206_v36, %s1479_s4 }
0x1793   :  { %1180 = vrot.lane.b32.xlu0 %v1178_v46, %s1479_s4 }
0x1804   :  { %v1209_v43 = vpop.permute.xlu1 %1208 }
0x1805   :  { %v1211_v44 = vadd.f32 %v1209_v43, %v1201_v52  ;;  %v1181_v20 = vpop.permute.xlu0 %1180 }
0x1806   :  { %v1183_v7 = vadd.f32 %v1181_v20, %v1173_v42 }
0x1807   :  { %1472 = vtanh.f32 %v1211_v44  ;;  %v1221_v8 = vadd.f32 %v1220_v13, %v1211_v44 }
0x1808   :  { %1474 = vtanh.f32 %v1183_v7  ;;  %v1192_v4 = vmul.f32 0.0, %v1183_v7 }
0x180a   :  { %v1193_v9 = vadd.f32 %v1192_v4, %v1082_v41 }
0x1811   :  { %v1473_v51 = vpop.eup %1472 }
0x1812   :  { %v1475_v50 = vpop.eup %1474  ;;  %1214 = vrot.lane.b32.xlu1 %v1473_v51, %s1478_s2 }
0x1813   :  { %1186 = vrot.lane.b32.xlu0 %v1475_v50, %s1478_s2 }
0x1884   :  { %v1215_v47 = vpop.permute.xlu1 %1214 }
0x1885   :  { %v1217_v54 = vmul.f32 %v1469_v38, %v1215_v47  ;;  %v1187_v2 = vpop.permute.xlu0 %1186 }
0x1886   :  { %v1189_v55 = vmul.f32 %v1471_v45, %v1187_v2 }
0x1887   :  { %v1219_v1 = vadd.f32 %v1218_v49, %v1217_v54 }
0x1888   :  { %v1190_v3 = vmul.f32 0.0, %v1189_v55 }
0x1889   :  { %1227 = vrot.lane.b32.xlu1 %v1219_v1, %s1478_s2 }
0x188a   :  { %v1191_v6 = vadd.f32 %v1190_v3, %v1922_v18 }
0x188c   :  { %1223 = vrot.lane.b32.xlu0 %v1191_v6, %s1479_s4 }
0x188d   :  { %1235 = vrot.lane.b32.xlu1 %v1221_v8, %s1478_s2 }
0x1890   :  { %1231 = vrot.lane.b32.xlu0 %v1193_v9, %s1479_s4 }
0x18fb   :  { %v1228_v12 = vpop.permute.xlu1 %1227 }
0x18fe   :  { %v1224_v63 = vpop.permute.xlu0 %1223 }
0x18ff   :  { %v1238_v56 = vsel %vm72_vm0, %v1224_v63, %v1228_v12  ;;  %v1236_v14 = vpop.permute.xlu1 %1235 }
0x1902   :  { %v1232_v57 = vpop.permute.xlu0 %1231 }
0x1903   :  { %v1239_v60 = vsel %vm219_vm1, %v1238_v56, %v1232_v57 }
0x1904   :  { %v1241_v58 = vsel %vm1240_vm2, %v1239_v60, %v1236_v14 }
0x1905   :  { %1242 = vst [vmem:[%s1953_s5] sm:$0xff] %v1241_v58 }

</bundles_post_ra>
